<compile_context>
chip_gen: v5e
topology: v5e:2x2
jax: 0.10.0
libtpu: 0.0.40
codegen_flags: <defaults>
</compile_context>

<pallas_src>
import functools

import jax
import jax.numpy as jnp
from jax import lax
from jax.experimental import pallas as pl
from jax.experimental.pallas import tpu as pltpu


def _round_up(x, m):
    return ((x + m - 1) // m) * m


def _device_kind():
    try:
        return jax.devices()[0].device_kind.lower()
    except Exception:
        return ""


def _resnet_block_kernel(x_ref, w1f_ref, w2f_ref, o_ref, *, H, W, Cop,
                         has_projection, ew_dtype):
    """One grid step: `b` batch elements packed along the lane axis.

    x_ref  : (1, Cp, L)            bf16  input, padded channels x (b * H * W) lanes
    w1f_ref: (Cop or 2*Cop, 9*Cp)  bf16  [conv1 (+ fused 1x1 projection)] weights
    w2f_ref: (Cop, 9*Cop)          bf16  conv2 weights
    o_ref  : (1, Cop, L)           f32   output
    """
    HW = H * W
    L = x_ref.shape[2]

    # Flat lane index -> (row, col) within each packed image; hoisted once.
    # HW / W are powers of two in the demo -> shift/and, generic fallback kept.
    p = lax.broadcasted_iota(jnp.int32, (1, L), 1)
    q = (p & (HW - 1)) if (HW & (HW - 1)) == 0 else (p % HW)
    if W & (W - 1) == 0:
        row = q >> (W.bit_length() - 1)
        col = q & (W - 1)
    else:
        row = q // W
        col = q % W

    taps = [(oh, ow) for oh in (-1, 0, 1) for ow in (-1, 0, 1)]
    # Border masks also zero any tap that would bleed across packed images.
    masks = [
        (row + oh >= 0) & (row + oh < H) & (col + ow >= 0) & (col + ow < W)
        for oh, ow in taps
    ]

    def im2col(a):
        """(C, L) -> (9*C, L) bf16 patch matrix for a 3x3 / pad=1 conv.

        Tap (oh, ow) is a flat lane rotation by oh*W + ow (pltpu.roll -> XLU vrot, a
        bundle slot otherwise idle in this kernel); lanes that wrapped around or
        crossed a row/image boundary are exactly the invalid positions and are zeroed.
        """
        zero = jnp.zeros_like(a)
        pieces = []
        for (oh, ow), valid in zip(taps, masks):
            off = oh * W + ow
            shifted = a if off == 0 else pltpu.roll(a, (-off) % L, axis=1)
            pieces.append(jnp.where(valid, shifted, zero))
        return jnp.concatenate(pieces, axis=0).astype(jnp.bfloat16)

    x = x_ref[0].astype(ew_dtype)                        # (Cp, L)

    # conv1 (+ fused 1x1 projection): one MXU matmul, K = 9*Cp, f32 accumulation.
    pre1 = jnp.dot(w1f_ref[...], im2col(x), preferred_element_type=jnp.float32)
    if has_projection:
        h1 = jnp.maximum(pre1[:Cop], 0.0)                # ReLU(conv1), f32
        residual = pre1[Cop:]                            # 1x1 projection, f32
    else:
        h1 = jnp.maximum(pre1, 0.0)
        # Identity shortcut straight from the resident input tile (no identity matmul).
        residual = x_ref[0].astype(jnp.float32)

    # conv2: one MXU matmul, K = 9*Cop.
    pre2 = jnp.dot(w2f_ref[...], im2col(h1.astype(ew_dtype)),
                   preferred_element_type=jnp.float32)
    h2 = jnp.maximum(pre2, 0.0)                          # ReLU(conv2), f32

    o_ref[0] = jnp.maximum(h2 + residual, 0.0).astype(o_ref.dtype)


def _resnet_block_impl(x_nchw, w1_oihw, w2_oihw, wp_oihw):
    N, Cin, H, W = x_nchw.shape
    Cout = w1_oihw.shape[0]
    HW = H * W
    # Pad channel dims to a multiple of 16 (full bf16 sublane pack -> tile-clean
    # concats and DMAs, and tile-aligned Cout row slices).
    Cp = _round_up(Cin, 16)
    Cop = _round_up(Cout, 16)

    kind = _device_kind()
    # bf16 elementwise through im2col only on chips with a bf16 VPU (v6e/v7x).
    ew_dtype = jnp.bfloat16 if ("v6" in kind or "v7" in kind) else jnp.float32
    # Megacore chips (2 TCs / device, v4/v7x): keep grid >= 2.  Single-TC chips
    # (v5e/v6e): pack the batch into lanes to amortise per-grid-step overhead.
    megacore = ("v7" in kind) or ("v4" in kind)
    max_lanes = 2048                       # per-step lane-width cap (vreg/VMEM budget)
    if megacore:
        b = max(1, min(N // 2, max_lanes // HW))
    else:
        b = max(1, min(N, max_lanes // HW))
    while N % b:
        b -= 1
    L = b * HW

    # --- matmul-ready weights (plain JAX glue, built once, VMEM-resident) ---
    # conv1 OIHW -> (Cop, 9*Cp), K ordered (kh, kw, cin) to match im2col's stacking.
    w1_k = jnp.pad(jnp.transpose(w1_oihw, (0, 2, 3, 1)),
                   ((0, Cop - Cout), (0, 0), (0, 0), (0, Cp - Cin))
                   ).reshape(Cop, 9 * Cp)
    w2f = jnp.pad(jnp.transpose(w2_oihw, (0, 2, 3, 1)),
                  ((0, Cop - Cout), (0, 0), (0, 0), (0, Cop - Cout))
                  ).reshape(Cop, 9 * Cop).astype(jnp.bfloat16)

    has_projection = wp_oihw is not None
    if has_projection:
        # 1x1 projection fused into conv1's matmul; it only reads the centre tap (t=4).
        wp_2d = wp_oihw.reshape(Cout, Cin)
        w_proj = jnp.zeros((Cop, 9 * Cp), w1_k.dtype)
        w_proj = w_proj.at[:Cout, 4 * Cp:4 * Cp + Cin].set(wp_2d)
        w1f = jnp.concatenate([w1_k, w_proj], axis=0).astype(jnp.bfloat16)  # (2*Cop, 9*Cp)
    else:
        if Cin != Cout:
            raise ValueError("identity shortcut requires in_channels == out_channels")
        w1f = w1_k.astype(jnp.bfloat16)                                     # (Cop, 9*Cp)

    # Channels-on-sublanes / batch-packed flat-spatial-on-lanes layout, bf16.
    # TODO(synk): at real ResNet sizes fuse this pad+cast into the producer of x so it
    #             doesn't cost an extra activation HBM round trip.
    x_flat = jnp.pad(x_nchw.reshape(N, Cin, HW), ((0, 0), (0, Cp - Cin), (0, 0)))
    x_pack = (x_flat.reshape(N // b, b, Cp, HW)
              .transpose(0, 2, 1, 3)
              .reshape(N // b, Cp, L)
              .astype(jnp.bfloat16))

    out = pl.pallas_call(
        functools.partial(_resnet_block_kernel, H=H, W=W, Cop=Cop,
                          has_projection=has_projection, ew_dtype=ew_dtype),
        out_shape=jax.ShapeDtypeStruct((N // b, Cop, L), jnp.float32),
        grid_spec=pltpu.PrefetchScalarGridSpec(
            num_scalar_prefetch=0,
            grid=(N // b,),                                    # batch axis: parallel
            in_specs=[
                pl.BlockSpec((1, Cp, L), lambda n: (n, 0, 0)),
                pl.BlockSpec(w1f.shape, lambda n: (0, 0)),     # resident weights
                pl.BlockSpec(w2f.shape, lambda n: (0, 0)),     # resident weights
            ],
            out_specs=pl.BlockSpec((1, Cop, L), lambda n: (n, 0, 0)),
        ),
        compiler_params=pltpu.CompilerParams(
            dimension_semantics=("parallel",)),
    )(x_pack, w1f, w2f)

    # Unpack lanes back to (N, Cout, H, W).
    out = (out.reshape(N // b, Cop, b, HW)
           .transpose(0, 2, 1, 3)
           .reshape(N, Cop, H, W))
    return out[:, :Cout]


_resnet_block_jit = jax.jit(_resnet_block_impl)


def resnet_block(x_nchw, w1_oihw, w2_oihw, wp_oihw=None, *, stride=1):
    """x (N, Cin, H, W) f32 -> (N, Cout, H, W) f32; PyTorch ResNetBlock.forward semantics.

    Note: the skip path (identity or 1x1 projection) uses the bf16-rounded input to
    match the kernel's mixed precision; PyTorch keeps the skip in f32.
    """
    if stride != 1:
        # TODO(synk): stride > 1 (downsampling block) not implemented in the kernel.
        raise NotImplementedError("ResNetBlock Pallas kernel only supports stride=1")
    return _resnet_block_jit(x_nchw, w1_oihw, w2_oihw, wp_oihw)


def _ref_forward(x_nchw, w1_oihw, w2_oihw, wp_oihw=None):
    """Pure-JAX NCHW reference mirroring the PyTorch module, with the same
    bf16-operand / f32-accumulation mixed precision as the kernel."""
    dn = ("NCHW", "OIHW", "NCHW")
    conv = functools.partial(
        lax.conv_general_dilated, window_strides=(1, 1), dimension_numbers=dn,
        preferred_element_type=jnp.float32)
    xb = x_nchw.astype(jnp.bfloat16)
    residual = (xb.astype(jnp.float32) if wp_oihw is None
                else conv(xb, wp_oihw.astype(jnp.bfloat16), padding="VALID"))
    h1 = jax.nn.relu(conv(xb, w1_oihw.astype(jnp.bfloat16), padding=[(1, 1), (1, 1)]))
    h2 = jax.nn.relu(conv(h1.astype(jnp.bfloat16), w2_oihw.astype(jnp.bfloat16),
                          padding=[(1, 1), (1, 1)]))
    return jax.nn.relu(h2 + residual)


if __name__ == "__main__":
    # ResNetBlock(in_channels=4, out_channels=8, stride=1): projection path active.
    N, Cin, Cout, H, W = 2, 4, 8, 16, 16

    key = jax.random.PRNGKey(0)
    kx, k1, k2, kp = jax.random.split(key, 4)

    # PyTorch-layout tensors: NCHW input, OIHW conv weights (bias=False).
    x = jax.random.normal(kx, (N, Cin, H, W), dtype=jnp.float32)
    w1 = 0.1 * jax.random.normal(k1, (Cout, Cin, 3, 3), dtype=jnp.float32)
    w2 = 0.1 * jax.random.normal(k2, (Cout, Cout, 3, 3), dtype=jnp.float32)
    wp = 0.1 * jax.random.normal(kp, (Cout, Cin, 1, 1), dtype=jnp.float32)

    out = jax.block_until_ready(resnet_block(x, w1, w2, wp))
    ref = _ref_forward(x, w1, w2, wp)

    assert out.shape == (N, Cout, H, W)
    assert jnp.allclose(out, ref, atol=1e-2, rtol=1e-2), "mismatch vs reference"

    print("KERNEL_OK")
</pallas_src>

<mosaic_0001>
module attributes {stable_mosaic.version = 11 : i64} {
  func.func @_resnet_block_kernel(%arg0: i32, %arg1: memref<1x16x512xbf16, #tpu.memory_space<vmem>>, %arg2: memref<32x144xbf16, #tpu.memory_space<vmem>>, %arg3: memref<16x144xbf16, #tpu.memory_space<vmem>>, %arg4: memref<1x16x512xf32, #tpu.memory_space<vmem>>) attributes {dimension_semantics = [#tpu.dimension_semantics<parallel>], iteration_bounds = array<i64: 1>, scalar_prefetch = 0 : i64, scratch_operands = 0 : i64, tpu.core_type = #tpu.core_type<tc>, window_params = [{transform_indices = @transform_0, window_bounds = array<i64: 1, 16, 512>}, {pipeline_mode = #tpu.pipeline_mode<synchronous>, transform_indices = @transform_1, window_bounds = array<i64: 32, 144>}, {pipeline_mode = #tpu.pipeline_mode<synchronous>, transform_indices = @transform_2, window_bounds = array<i64: 16, 144>}, {transform_indices = @transform_3, window_bounds = array<i64: 1, 16, 512>}]} {
    %0 = tpu.iota {dimensions = array<i32: 1>} : vector<1x512xi32>
    %c255_i32 = arith.constant 255 : i32
    %1 = vector.broadcast %c255_i32 : i32 to vector<1x512xi32>
    %2 = arith.andi %0, %1 : vector<1x512xi32>
    %c4_i32 = arith.constant 4 : i32
    %3 = vector.broadcast %c4_i32 : i32 to vector<1x512xi32>
    %4 = arith.shrsi %2, %3 : vector<1x512xi32>
    %c15_i32 = arith.constant 15 : i32
    %5 = vector.broadcast %c15_i32 : i32 to vector<1x512xi32>
    %6 = arith.andi %2, %5 : vector<1x512xi32>
    %c-1_i32 = arith.constant -1 : i32
    %7 = vector.broadcast %c-1_i32 : i32 to vector<1x512xi32>
    %8 = arith.addi %4, %7 : vector<1x512xi32>
    %c0_i32 = arith.constant 0 : i32
    %9 = vector.broadcast %c0_i32 : i32 to vector<1x512xi32>
    %10 = arith.cmpi sge, %8, %9 : vector<1x512xi32>
    %c-1_i32_0 = arith.constant -1 : i32
    %11 = vector.broadcast %c-1_i32_0 : i32 to vector<1x512xi32>
    %12 = arith.addi %4, %11 : vector<1x512xi32>
    %c16_i32 = arith.constant 16 : i32
    %13 = vector.broadcast %c16_i32 : i32 to vector<1x512xi32>
    %14 = arith.cmpi slt, %12, %13 : vector<1x512xi32>
    %15 = arith.andi %10, %14 : vector<1x512xi1>
    %c-1_i32_1 = arith.constant -1 : i32
    %16 = vector.broadcast %c-1_i32_1 : i32 to vector<1x512xi32>
    %17 = arith.addi %6, %16 : vector<1x512xi32>
    %c0_i32_2 = arith.constant 0 : i32
    %18 = vector.broadcast %c0_i32_2 : i32 to vector<1x512xi32>
    %19 = arith.cmpi sge, %17, %18 : vector<1x512xi32>
    %20 = arith.andi %15, %19 : vector<1x512xi1>
    %c-1_i32_3 = arith.constant -1 : i32
    %21 = vector.broadcast %c-1_i32_3 : i32 to vector<1x512xi32>
    %22 = arith.addi %6, %21 : vector<1x512xi32>
    %c16_i32_4 = arith.constant 16 : i32
    %23 = vector.broadcast %c16_i32_4 : i32 to vector<1x512xi32>
    %24 = arith.cmpi slt, %22, %23 : vector<1x512xi32>
    %25 = arith.andi %20, %24 : vector<1x512xi1>
    %c-1_i32_5 = arith.constant -1 : i32
    %26 = vector.broadcast %c-1_i32_5 : i32 to vector<1x512xi32>
    %27 = arith.addi %4, %26 : vector<1x512xi32>
    %c0_i32_6 = arith.constant 0 : i32
    %28 = vector.broadcast %c0_i32_6 : i32 to vector<1x512xi32>
    %29 = arith.cmpi sge, %27, %28 : vector<1x512xi32>
    %c-1_i32_7 = arith.constant -1 : i32
    %30 = vector.broadcast %c-1_i32_7 : i32 to vector<1x512xi32>
    %31 = arith.addi %4, %30 : vector<1x512xi32>
    %c16_i32_8 = arith.constant 16 : i32
    %32 = vector.broadcast %c16_i32_8 : i32 to vector<1x512xi32>
    %33 = arith.cmpi slt, %31, %32 : vector<1x512xi32>
    %34 = arith.andi %29, %33 : vector<1x512xi1>
    %c0_i32_9 = arith.constant 0 : i32
    %35 = vector.broadcast %c0_i32_9 : i32 to vector<1x512xi32>
    %36 = arith.addi %6, %35 : vector<1x512xi32>
    %c0_i32_10 = arith.constant 0 : i32
    %37 = vector.broadcast %c0_i32_10 : i32 to vector<1x512xi32>
    %38 = arith.cmpi sge, %36, %37 : vector<1x512xi32>
    %39 = arith.andi %34, %38 : vector<1x512xi1>
    %c0_i32_11 = arith.constant 0 : i32
    %40 = vector.broadcast %c0_i32_11 : i32 to vector<1x512xi32>
    %41 = arith.addi %6, %40 : vector<1x512xi32>
    %c16_i32_12 = arith.constant 16 : i32
    %42 = vector.broadcast %c16_i32_12 : i32 to vector<1x512xi32>
    %43 = arith.cmpi slt, %41, %42 : vector<1x512xi32>
    %44 = arith.andi %39, %43 : vector<1x512xi1>
    %c-1_i32_13 = arith.constant -1 : i32
    %45 = vector.broadcast %c-1_i32_13 : i32 to vector<1x512xi32>
    %46 = arith.addi %4, %45 : vector<1x512xi32>
    %c0_i32_14 = arith.constant 0 : i32
    %47 = vector.broadcast %c0_i32_14 : i32 to vector<1x512xi32>
    %48 = arith.cmpi sge, %46, %47 : vector<1x512xi32>
    %c-1_i32_15 = arith.constant -1 : i32
    %49 = vector.broadcast %c-1_i32_15 : i32 to vector<1x512xi32>
    %50 = arith.addi %4, %49 : vector<1x512xi32>
    %c16_i32_16 = arith.constant 16 : i32
    %51 = vector.broadcast %c16_i32_16 : i32 to vector<1x512xi32>
    %52 = arith.cmpi slt, %50, %51 : vector<1x512xi32>
    %53 = arith.andi %48, %52 : vector<1x512xi1>
    %c1_i32 = arith.constant 1 : i32
    %54 = vector.broadcast %c1_i32 : i32 to vector<1x512xi32>
    %55 = arith.addi %6, %54 : vector<1x512xi32>
    %c0_i32_17 = arith.constant 0 : i32
    %56 = vector.broadcast %c0_i32_17 : i32 to vector<1x512xi32>
    %57 = arith.cmpi sge, %55, %56 : vector<1x512xi32>
    %58 = arith.andi %53, %57 : vector<1x512xi1>
    %c1_i32_18 = arith.constant 1 : i32
    %59 = vector.broadcast %c1_i32_18 : i32 to vector<1x512xi32>
    %60 = arith.addi %6, %59 : vector<1x512xi32>
    %c16_i32_19 = arith.constant 16 : i32
    %61 = vector.broadcast %c16_i32_19 : i32 to vector<1x512xi32>
    %62 = arith.cmpi slt, %60, %61 : vector<1x512xi32>
    %63 = arith.andi %58, %62 : vector<1x512xi1>
    %c0_i32_20 = arith.constant 0 : i32
    %64 = vector.broadcast %c0_i32_20 : i32 to vector<1x512xi32>
    %65 = arith.addi %4, %64 : vector<1x512xi32>
    %c0_i32_21 = arith.constant 0 : i32
    %66 = vector.broadcast %c0_i32_21 : i32 to vector<1x512xi32>
    %67 = arith.cmpi sge, %65, %66 : vector<1x512xi32>
    %c0_i32_22 = arith.constant 0 : i32
    %68 = vector.broadcast %c0_i32_22 : i32 to vector<1x512xi32>
    %69 = arith.addi %4, %68 : vector<1x512xi32>
    %c16_i32_23 = arith.constant 16 : i32
    %70 = vector.broadcast %c16_i32_23 : i32 to vector<1x512xi32>
    %71 = arith.cmpi slt, %69, %70 : vector<1x512xi32>
    %72 = arith.andi %67, %71 : vector<1x512xi1>
    %c-1_i32_24 = arith.constant -1 : i32
    %73 = vector.broadcast %c-1_i32_24 : i32 to vector<1x512xi32>
    %74 = arith.addi %6, %73 : vector<1x512xi32>
    %c0_i32_25 = arith.constant 0 : i32
    %75 = vector.broadcast %c0_i32_25 : i32 to vector<1x512xi32>
    %76 = arith.cmpi sge, %74, %75 : vector<1x512xi32>
    %77 = arith.andi %72, %76 : vector<1x512xi1>
    %c-1_i32_26 = arith.constant -1 : i32
    %78 = vector.broadcast %c-1_i32_26 : i32 to vector<1x512xi32>
    %79 = arith.addi %6, %78 : vector<1x512xi32>
    %c16_i32_27 = arith.constant 16 : i32
    %80 = vector.broadcast %c16_i32_27 : i32 to vector<1x512xi32>
    %81 = arith.cmpi slt, %79, %80 : vector<1x512xi32>
    %82 = arith.andi %77, %81 : vector<1x512xi1>
    %c0_i32_28 = arith.constant 0 : i32
    %83 = vector.broadcast %c0_i32_28 : i32 to vector<1x512xi32>
    %84 = arith.addi %4, %83 : vector<1x512xi32>
    %c0_i32_29 = arith.constant 0 : i32
    %85 = vector.broadcast %c0_i32_29 : i32 to vector<1x512xi32>
    %86 = arith.cmpi sge, %84, %85 : vector<1x512xi32>
    %c0_i32_30 = arith.constant 0 : i32
    %87 = vector.broadcast %c0_i32_30 : i32 to vector<1x512xi32>
    %88 = arith.addi %4, %87 : vector<1x512xi32>
    %c16_i32_31 = arith.constant 16 : i32
    %89 = vector.broadcast %c16_i32_31 : i32 to vector<1x512xi32>
    %90 = arith.cmpi slt, %88, %89 : vector<1x512xi32>
    %91 = arith.andi %86, %90 : vector<1x512xi1>
    %c0_i32_32 = arith.constant 0 : i32
    %92 = vector.broadcast %c0_i32_32 : i32 to vector<1x512xi32>
    %93 = arith.addi %6, %92 : vector<1x512xi32>
    %c0_i32_33 = arith.constant 0 : i32
    %94 = vector.broadcast %c0_i32_33 : i32 to vector<1x512xi32>
    %95 = arith.cmpi sge, %93, %94 : vector<1x512xi32>
    %96 = arith.andi %91, %95 : vector<1x512xi1>
    %c0_i32_34 = arith.constant 0 : i32
    %97 = vector.broadcast %c0_i32_34 : i32 to vector<1x512xi32>
    %98 = arith.addi %6, %97 : vector<1x512xi32>
    %c16_i32_35 = arith.constant 16 : i32
    %99 = vector.broadcast %c16_i32_35 : i32 to vector<1x512xi32>
    %100 = arith.cmpi slt, %98, %99 : vector<1x512xi32>
    %101 = arith.andi %96, %100 : vector<1x512xi1>
    %c0_i32_36 = arith.constant 0 : i32
    %102 = vector.broadcast %c0_i32_36 : i32 to vector<1x512xi32>
    %103 = arith.addi %4, %102 : vector<1x512xi32>
    %c0_i32_37 = arith.constant 0 : i32
    %104 = vector.broadcast %c0_i32_37 : i32 to vector<1x512xi32>
    %105 = arith.cmpi sge, %103, %104 : vector<1x512xi32>
    %c0_i32_38 = arith.constant 0 : i32
    %106 = vector.broadcast %c0_i32_38 : i32 to vector<1x512xi32>
    %107 = arith.addi %4, %106 : vector<1x512xi32>
    %c16_i32_39 = arith.constant 16 : i32
    %108 = vector.broadcast %c16_i32_39 : i32 to vector<1x512xi32>
    %109 = arith.cmpi slt, %107, %108 : vector<1x512xi32>
    %110 = arith.andi %105, %109 : vector<1x512xi1>
    %c1_i32_40 = arith.constant 1 : i32
    %111 = vector.broadcast %c1_i32_40 : i32 to vector<1x512xi32>
    %112 = arith.addi %6, %111 : vector<1x512xi32>
    %c0_i32_41 = arith.constant 0 : i32
    %113 = vector.broadcast %c0_i32_41 : i32 to vector<1x512xi32>
    %114 = arith.cmpi sge, %112, %113 : vector<1x512xi32>
    %115 = arith.andi %110, %114 : vector<1x512xi1>
    %c1_i32_42 = arith.constant 1 : i32
    %116 = vector.broadcast %c1_i32_42 : i32 to vector<1x512xi32>
    %117 = arith.addi %6, %116 : vector<1x512xi32>
    %c16_i32_43 = arith.constant 16 : i32
    %118 = vector.broadcast %c16_i32_43 : i32 to vector<1x512xi32>
    %119 = arith.cmpi slt, %117, %118 : vector<1x512xi32>
    %120 = arith.andi %115, %119 : vector<1x512xi1>
    %c1_i32_44 = arith.constant 1 : i32
    %121 = vector.broadcast %c1_i32_44 : i32 to vector<1x512xi32>
    %122 = arith.addi %4, %121 : vector<1x512xi32>
    %c0_i32_45 = arith.constant 0 : i32
    %123 = vector.broadcast %c0_i32_45 : i32 to vector<1x512xi32>
    %124 = arith.cmpi sge, %122, %123 : vector<1x512xi32>
    %c1_i32_46 = arith.constant 1 : i32
    %125 = vector.broadcast %c1_i32_46 : i32 to vector<1x512xi32>
    %126 = arith.addi %4, %125 : vector<1x512xi32>
    %c16_i32_47 = arith.constant 16 : i32
    %127 = vector.broadcast %c16_i32_47 : i32 to vector<1x512xi32>
    %128 = arith.cmpi slt, %126, %127 : vector<1x512xi32>
    %129 = arith.andi %124, %128 : vector<1x512xi1>
    %c-1_i32_48 = arith.constant -1 : i32
    %130 = vector.broadcast %c-1_i32_48 : i32 to vector<1x512xi32>
    %131 = arith.addi %6, %130 : vector<1x512xi32>
    %c0_i32_49 = arith.constant 0 : i32
    %132 = vector.broadcast %c0_i32_49 : i32 to vector<1x512xi32>
    %133 = arith.cmpi sge, %131, %132 : vector<1x512xi32>
    %134 = arith.andi %129, %133 : vector<1x512xi1>
    %c-1_i32_50 = arith.constant -1 : i32
    %135 = vector.broadcast %c-1_i32_50 : i32 to vector<1x512xi32>
    %136 = arith.addi %6, %135 : vector<1x512xi32>
    %c16_i32_51 = arith.constant 16 : i32
    %137 = vector.broadcast %c16_i32_51 : i32 to vector<1x512xi32>
    %138 = arith.cmpi slt, %136, %137 : vector<1x512xi32>
    %139 = arith.andi %134, %138 : vector<1x512xi1>
    %c1_i32_52 = arith.constant 1 : i32
    %140 = vector.broadcast %c1_i32_52 : i32 to vector<1x512xi32>
    %141 = arith.addi %4, %140 : vector<1x512xi32>
    %c0_i32_53 = arith.constant 0 : i32
    %142 = vector.broadcast %c0_i32_53 : i32 to vector<1x512xi32>
    %143 = arith.cmpi sge, %141, %142 : vector<1x512xi32>
    %c1_i32_54 = arith.constant 1 : i32
    %144 = vector.broadcast %c1_i32_54 : i32 to vector<1x512xi32>
    %145 = arith.addi %4, %144 : vector<1x512xi32>
    %c16_i32_55 = arith.constant 16 : i32
    %146 = vector.broadcast %c16_i32_55 : i32 to vector<1x512xi32>
    %147 = arith.cmpi slt, %145, %146 : vector<1x512xi32>
    %148 = arith.andi %143, %147 : vector<1x512xi1>
    %c0_i32_56 = arith.constant 0 : i32
    %149 = vector.broadcast %c0_i32_56 : i32 to vector<1x512xi32>
    %150 = arith.addi %6, %149 : vector<1x512xi32>
    %c0_i32_57 = arith.constant 0 : i32
    %151 = vector.broadcast %c0_i32_57 : i32 to vector<1x512xi32>
    %152 = arith.cmpi sge, %150, %151 : vector<1x512xi32>
    %153 = arith.andi %148, %152 : vector<1x512xi1>
    %c0_i32_58 = arith.constant 0 : i32
    %154 = vector.broadcast %c0_i32_58 : i32 to vector<1x512xi32>
    %155 = arith.addi %6, %154 : vector<1x512xi32>
    %c16_i32_59 = arith.constant 16 : i32
    %156 = vector.broadcast %c16_i32_59 : i32 to vector<1x512xi32>
    %157 = arith.cmpi slt, %155, %156 : vector<1x512xi32>
    %158 = arith.andi %153, %157 : vector<1x512xi1>
    %c1_i32_60 = arith.constant 1 : i32
    %159 = vector.broadcast %c1_i32_60 : i32 to vector<1x512xi32>
    %160 = arith.addi %4, %159 : vector<1x512xi32>
    %c0_i32_61 = arith.constant 0 : i32
    %161 = vector.broadcast %c0_i32_61 : i32 to vector<1x512xi32>
    %162 = arith.cmpi sge, %160, %161 : vector<1x512xi32>
    %c1_i32_62 = arith.constant 1 : i32
    %163 = vector.broadcast %c1_i32_62 : i32 to vector<1x512xi32>
    %164 = arith.addi %4, %163 : vector<1x512xi32>
    %c16_i32_63 = arith.constant 16 : i32
    %165 = vector.broadcast %c16_i32_63 : i32 to vector<1x512xi32>
    %166 = arith.cmpi slt, %164, %165 : vector<1x512xi32>
    %167 = arith.andi %162, %166 : vector<1x512xi1>
    %c1_i32_64 = arith.constant 1 : i32
    %168 = vector.broadcast %c1_i32_64 : i32 to vector<1x512xi32>
    %169 = arith.addi %6, %168 : vector<1x512xi32>
    %c0_i32_65 = arith.constant 0 : i32
    %170 = vector.broadcast %c0_i32_65 : i32 to vector<1x512xi32>
    %171 = arith.cmpi sge, %169, %170 : vector<1x512xi32>
    %172 = arith.andi %167, %171 : vector<1x512xi1>
    %c1_i32_66 = arith.constant 1 : i32
    %173 = vector.broadcast %c1_i32_66 : i32 to vector<1x512xi32>
    %174 = arith.addi %6, %173 : vector<1x512xi32>
    %c16_i32_67 = arith.constant 16 : i32
    %175 = vector.broadcast %c16_i32_67 : i32 to vector<1x512xi32>
    %176 = arith.cmpi slt, %174, %175 : vector<1x512xi32>
    %177 = arith.andi %172, %176 : vector<1x512xi1>
    %c0 = arith.constant 0 : index
    %c0_68 = arith.constant 0 : index
    %c0_69 = arith.constant 0 : index
    %178 = vector.load %arg1[%c0, %c0_68, %c0_69] : memref<1x16x512xbf16, #tpu.memory_space<vmem>>, vector<1x16x512xbf16>
    %179 = vector.shape_cast %178 : vector<1x16x512xbf16> to vector<16x512xbf16>
    %180 = arith.extf %179 : vector<16x512xbf16> to vector<16x512xf32>
    %c0_70 = arith.constant 0 : index
    %c0_71 = arith.constant 0 : index
    %181 = vector.load %arg2[%c0_70, %c0_71] : memref<32x144xbf16, #tpu.memory_space<vmem>>, vector<32x144xbf16>
    %cst = arith.constant 0.000000e+00 : f32
    %182 = vector.broadcast %cst : f32 to vector<16x512xf32>
    %c17_i32 = arith.constant 17 : i32
    %183 = tpu.dynamic_rotate %180 by %c17_i32 dim 1 : vector<16x512xf32>, i32 -> vector<16x512xf32>
    %184 = vector.shape_cast %25 : vector<1x512xi1> to vector<1x512xi1>
    %185 = vector.broadcast %184 : vector<1x512xi1> to vector<16x512xi1>
    %186 = arith.select %185, %183, %182 : vector<16x512xi1>, vector<16x512xf32>
    %c16_i32_72 = arith.constant 16 : i32
    %187 = tpu.dynamic_rotate %180 by %c16_i32_72 dim 1 : vector<16x512xf32>, i32 -> vector<16x512xf32>
    %188 = vector.shape_cast %44 : vector<1x512xi1> to vector<1x512xi1>
    %189 = vector.broadcast %188 : vector<1x512xi1> to vector<16x512xi1>
    %190 = arith.select %189, %187, %182 : vector<16x512xi1>, vector<16x512xf32>
    %c15_i32_73 = arith.constant 15 : i32
    %191 = tpu.dynamic_rotate %180 by %c15_i32_73 dim 1 : vector<16x512xf32>, i32 -> vector<16x512xf32>
    %192 = vector.shape_cast %63 : vector<1x512xi1> to vector<1x512xi1>
    %193 = vector.broadcast %192 : vector<1x512xi1> to vector<16x512xi1>
    %194 = arith.select %193, %191, %182 : vector<16x512xi1>, vector<16x512xf32>
    %c1_i32_74 = arith.constant 1 : i32
    %195 = tpu.dynamic_rotate %180 by %c1_i32_74 dim 1 : vector<16x512xf32>, i32 -> vector<16x512xf32>
    %196 = vector.shape_cast %82 : vector<1x512xi1> to vector<1x512xi1>
    %197 = vector.broadcast %196 : vector<1x512xi1> to vector<16x512xi1>
    %198 = arith.select %197, %195, %182 : vector<16x512xi1>, vector<16x512xf32>
    %199 = vector.shape_cast %101 : vector<1x512xi1> to vector<1x512xi1>
    %200 = vector.broadcast %199 : vector<1x512xi1> to vector<16x512xi1>
    %201 = arith.select %200, %180, %182 : vector<16x512xi1>, vector<16x512xf32>
    %c511_i32 = arith.constant 511 : i32
    %202 = tpu.dynamic_rotate %180 by %c511_i32 dim 1 : vector<16x512xf32>, i32 -> vector<16x512xf32>
    %203 = vector.shape_cast %120 : vector<1x512xi1> to vector<1x512xi1>
    %204 = vector.broadcast %203 : vector<1x512xi1> to vector<16x512xi1>
    %205 = arith.select %204, %202, %182 : vector<16x512xi1>, vector<16x512xf32>
    %c497_i32 = arith.constant 497 : i32
    %206 = tpu.dynamic_rotate %180 by %c497_i32 dim 1 : vector<16x512xf32>, i32 -> vector<16x512xf32>
    %207 = vector.shape_cast %139 : vector<1x512xi1> to vector<1x512xi1>
    %208 = vector.broadcast %207 : vector<1x512xi1> to vector<16x512xi1>
    %209 = arith.select %208, %206, %182 : vector<16x512xi1>, vector<16x512xf32>
    %c496_i32 = arith.constant 496 : i32
    %210 = tpu.dynamic_rotate %180 by %c496_i32 dim 1 : vector<16x512xf32>, i32 -> vector<16x512xf32>
    %211 = vector.shape_cast %158 : vector<1x512xi1> to vector<1x512xi1>
    %212 = vector.broadcast %211 : vector<1x512xi1> to vector<16x512xi1>
    %213 = arith.select %212, %210, %182 : vector<16x512xi1>, vector<16x512xf32>
    %c495_i32 = arith.constant 495 : i32
    %214 = tpu.dynamic_rotate %180 by %c495_i32 dim 1 : vector<16x512xf32>, i32 -> vector<16x512xf32>
    %215 = vector.shape_cast %177 : vector<1x512xi1> to vector<1x512xi1>
    %216 = vector.broadcast %215 : vector<1x512xi1> to vector<16x512xi1>
    %217 = arith.select %216, %214, %182 : vector<16x512xi1>, vector<16x512xf32>
    %218 = tpu.concatenate %186, %190, %194, %198, %201, %205, %209, %213, %217 in 0 : vector<16x512xf32>, vector<16x512xf32>, vector<16x512xf32>, vector<16x512xf32>, vector<16x512xf32>, vector<16x512xf32>, vector<16x512xf32>, vector<16x512xf32>, vector<16x512xf32> -> vector<144x512xf32>
    %219 = arith.truncf %218 : vector<144x512xf32> to vector<144x512xbf16>
    %cst_75 = arith.constant dense<0.000000e+00> : vector<32x512xf32>
    %220 = tpu.matmul %181, %219, %cst_75 {dimension_numbers = #tpu.dot_dimension_numbers<[1], [0], [0], [1], [0, 0, 1, 1], [], []>} : vector<32x144xbf16>, vector<144x512xbf16>, vector<32x512xf32> -> vector<32x512xf32>
    %221 = vector.extract_strided_slice %220 {offsets = [0, 0], sizes = [16, 512], strides = [1, 1]} : vector<32x512xf32> to vector<16x512xf32>
    %cst_76 = arith.constant 0.000000e+00 : f32
    %222 = vector.broadcast %cst_76 : f32 to vector<16x512xf32>
    %223 = arith.maximumf %221, %222 : vector<16x512xf32>
    %224 = vector.extract_strided_slice %220 {offsets = [16, 0], sizes = [16, 512], strides = [1, 1]} : vector<32x512xf32> to vector<16x512xf32>
    %c0_77 = arith.constant 0 : index
    %c0_78 = arith.constant 0 : index
    %225 = vector.load %arg3[%c0_77, %c0_78] : memref<16x144xbf16, #tpu.memory_space<vmem>>, vector<16x144xbf16>
    %cst_79 = arith.constant 0.000000e+00 : f32
    %226 = vector.broadcast %cst_79 : f32 to vector<16x512xf32>
    %c17_i32_80 = arith.constant 17 : i32
    %227 = tpu.dynamic_rotate %223 by %c17_i32_80 dim 1 : vector<16x512xf32>, i32 -> vector<16x512xf32>
    %228 = vector.shape_cast %25 : vector<1x512xi1> to vector<1x512xi1>
    %229 = vector.broadcast %228 : vector<1x512xi1> to vector<16x512xi1>
    %230 = arith.select %229, %227, %226 : vector<16x512xi1>, vector<16x512xf32>
    %c16_i32_81 = arith.constant 16 : i32
    %231 = tpu.dynamic_rotate %223 by %c16_i32_81 dim 1 : vector<16x512xf32>, i32 -> vector<16x512xf32>
    %232 = vector.shape_cast %44 : vector<1x512xi1> to vector<1x512xi1>
    %233 = vector.broadcast %232 : vector<1x512xi1> to vector<16x512xi1>
    %234 = arith.select %233, %231, %226 : vector<16x512xi1>, vector<16x512xf32>
    %c15_i32_82 = arith.constant 15 : i32
    %235 = tpu.dynamic_rotate %223 by %c15_i32_82 dim 1 : vector<16x512xf32>, i32 -> vector<16x512xf32>
    %236 = vector.shape_cast %63 : vector<1x512xi1> to vector<1x512xi1>
    %237 = vector.broadcast %236 : vector<1x512xi1> to vector<16x512xi1>
    %238 = arith.select %237, %235, %226 : vector<16x512xi1>, vector<16x512xf32>
    %c1_i32_83 = arith.constant 1 : i32
    %239 = tpu.dynamic_rotate %223 by %c1_i32_83 dim 1 : vector<16x512xf32>, i32 -> vector<16x512xf32>
    %240 = vector.shape_cast %82 : vector<1x512xi1> to vector<1x512xi1>
    %241 = vector.broadcast %240 : vector<1x512xi1> to vector<16x512xi1>
    %242 = arith.select %241, %239, %226 : vector<16x512xi1>, vector<16x512xf32>
    %243 = vector.shape_cast %101 : vector<1x512xi1> to vector<1x512xi1>
    %244 = vector.broadcast %243 : vector<1x512xi1> to vector<16x512xi1>
    %245 = arith.select %244, %223, %226 : vector<16x512xi1>, vector<16x512xf32>
    %c511_i32_84 = arith.constant 511 : i32
    %246 = tpu.dynamic_rotate %223 by %c511_i32_84 dim 1 : vector<16x512xf32>, i32 -> vector<16x512xf32>
    %247 = vector.shape_cast %120 : vector<1x512xi1> to vector<1x512xi1>
    %248 = vector.broadcast %247 : vector<1x512xi1> to vector<16x512xi1>
    %249 = arith.select %248, %246, %226 : vector<16x512xi1>, vector<16x512xf32>
    %c497_i32_85 = arith.constant 497 : i32
    %250 = tpu.dynamic_rotate %223 by %c497_i32_85 dim 1 : vector<16x512xf32>, i32 -> vector<16x512xf32>
    %251 = vector.shape_cast %139 : vector<1x512xi1> to vector<1x512xi1>
    %252 = vector.broadcast %251 : vector<1x512xi1> to vector<16x512xi1>
    %253 = arith.select %252, %250, %226 : vector<16x512xi1>, vector<16x512xf32>
    %c496_i32_86 = arith.constant 496 : i32
    %254 = tpu.dynamic_rotate %223 by %c496_i32_86 dim 1 : vector<16x512xf32>, i32 -> vector<16x512xf32>
    %255 = vector.shape_cast %158 : vector<1x512xi1> to vector<1x512xi1>
    %256 = vector.broadcast %255 : vector<1x512xi1> to vector<16x512xi1>
    %257 = arith.select %256, %254, %226 : vector<16x512xi1>, vector<16x512xf32>
    %c495_i32_87 = arith.constant 495 : i32
    %258 = tpu.dynamic_rotate %223 by %c495_i32_87 dim 1 : vector<16x512xf32>, i32 -> vector<16x512xf32>
    %259 = vector.shape_cast %177 : vector<1x512xi1> to vector<1x512xi1>
    %260 = vector.broadcast %259 : vector<1x512xi1> to vector<16x512xi1>
    %261 = arith.select %260, %258, %226 : vector<16x512xi1>, vector<16x512xf32>
    %262 = tpu.concatenate %230, %234, %238, %242, %245, %249, %253, %257, %261 in 0 : vector<16x512xf32>, vector<16x512xf32>, vector<16x512xf32>, vector<16x512xf32>, vector<16x512xf32>, vector<16x512xf32>, vector<16x512xf32>, vector<16x512xf32>, vector<16x512xf32> -> vector<144x512xf32>
    %263 = arith.truncf %262 : vector<144x512xf32> to vector<144x512xbf16>
    %cst_88 = arith.constant dense<0.000000e+00> : vector<16x512xf32>
    %264 = tpu.matmul %225, %263, %cst_88 {dimension_numbers = #tpu.dot_dimension_numbers<[1], [0], [0], [1], [0, 0, 1, 1], [], []>} : vector<16x144xbf16>, vector<144x512xbf16>, vector<16x512xf32> -> vector<16x512xf32>
    %cst_89 = arith.constant 0.000000e+00 : f32
    %265 = vector.broadcast %cst_89 : f32 to vector<16x512xf32>
    %266 = arith.maximumf %264, %265 : vector<16x512xf32>
    %267 = arith.addf %266, %224 : vector<16x512xf32>
    %cst_90 = arith.constant 0.000000e+00 : f32
    %268 = vector.broadcast %cst_90 : f32 to vector<16x512xf32>
    %269 = arith.maximumf %267, %268 : vector<16x512xf32>
    %c0_91 = arith.constant 0 : index
    %c0_92 = arith.constant 0 : index
    %c0_93 = arith.constant 0 : index
    %270 = vector.load %arg4[%c0_91, %c0_92, %c0_93] : memref<1x16x512xf32, #tpu.memory_space<vmem>>, vector<1x16x512xf32>
    %271 = vector.shape_cast %270 : vector<1x16x512xf32> to vector<16x512xf32>
    %272 = vector.shape_cast %269 : vector<16x512xf32> to vector<1x16x512xf32>
    tpu.vector_store %arg4[%c0_91, %c0_92, %c0_93], %272 {strides = array<i32>} : memref<1x16x512xf32, #tpu.memory_space<vmem>>, vector<1x16x512xf32>,
    return
  }
  func.func @transform_0(%arg0: i32) -> (i32, i32, i32) {
    %c0_i32 = arith.constant 0 : i32
    %c0_i32_0 = arith.constant 0 : i32
    %c0_i32_1 = arith.constant 0 : i32
    return %arg0, %c0_i32, %c0_i32_0 : i32, i32, i32
  }
  func.func @transform_1(%arg0: i32) -> (i32, i32) {
    %c0_i32 = arith.constant 0 : i32
    %c0_i32_0 = arith.constant 0 : i32
    %c0_i32_1 = arith.constant 0 : i32
    return %c0_i32, %c0_i32_0 : i32, i32
  }
  func.func @transform_2(%arg0: i32) -> (i32, i32) {
    %c0_i32 = arith.constant 0 : i32
    %c0_i32_0 = arith.constant 0 : i32
    %c0_i32_1 = arith.constant 0 : i32
    return %c0_i32, %c0_i32_0 : i32, i32
  }
  func.func @transform_3(%arg0: i32) -> (i32, i32, i32) {
    %c0_i32 = arith.constant 0 : i32
    %c0_i32_0 = arith.constant 0 : i32
    %c0_i32_1 = arith.constant 0 : i32
    return %arg0, %c0_i32, %c0_i32_0 : i32, i32, i32
  }
}

</mosaic_0001>

<bundles_post_ra>
// kernel: _resnet_block_impl.1
= control target key start
LH: loop header
LB: loop body
LE: loop exit
PB: predicated region body
PF: predicated region fallthrough
CT: control target
= control target key end

     0   :  { %s1809_s20 = smov 113   ;;  %s1810_s21 = smov 112   ;;  %v15_v17 = vlaneseq  ;;  %v3818_v34 = vmov 0  ;;  %v3820_v42 = vmov 0  ;;  %v3822_v47 = vmov 0  ;;  %s3678_s0 = inlined_call_operand.vmem [shape: bf16[1,16,512], index: 0, kind: input, shape index: {}]   ;;  %s3679_s1 = inlined_call_operand.vmem [shape: bf16[32,144], index: 1, kind: input, shape index: {}]   ;;  %s3680_s2 = inlined_call_operand.vmem [shape: bf16[16,144], index: 2, kind: input, shape index: {}]   ;;  %s3681_s3 = inlined_call_operand.vmem [shape: f32[1,16,512], index: 3, kind: output, shape index: {}]  }
   0x1   :  { %v1840_v0 = vld [vmem:[%s3678_s0] sm:$0xff]  ;;  %v1845_v1 = vld [vmem:[%s3678_s0 + $0x10] sm:$0xff]  ;;  %v1854_v6 = vld [vmem:[%s3678_s0 + $0x8] sm:$0xff]  ;;  %s1812_s22 = smov 1   ;;  %s1813_s23 = smov 111   ;;  %v3824_v53 = vmov 0 }
   0x2   :  { %v185_v2 = vunpack.c.h.bf16 %v1840_v0  ;;  %v189_v3 = vunpack.c.h.bf16 %v1845_v1  ;;  %v184_v4 = vunpack.c.l.bf16 %v1840_v0  ;;  %v188_v5 = vunpack.c.l.bf16 %v1845_v1  ;;  %v1859_v7 = vld [vmem:[%s3678_s0 + $0x18] sm:$0xff]  ;;  %s1811_s0 = smov 127   ;;  %s1814_s24 = smov 15  }
   0x3   :  { %v3711_v10 = vunpack.c.l.bf16 %v1854_v6  ;;  %v3710_v11 = vunpack.c.l.bf16 %v1859_v7  ;;  %v3705_v13 = vunpack.c.h.bf16 %v1854_v6  ;;  %v3704_v14 = vunpack.c.h.bf16 %v1859_v7  ;;  %s1815_s25 = smov 16   ;;  %s1816_s26 = smov 17  }
   0x4   :  { %v1499_v8 = vpack.i.bf16 %v189_v3, %v185_v2  ;;  %v1509_v9 = vpack.i.bf16 %v188_v5, %v184_v4  ;;  %v1915_v18 = vand.u32 127, %v15_v17  ;;  %v3826_v62 = vmov 0 }
   0x5   :  { %v1504_v12 = vpack.i.bf16 %v3710_v11, %v3711_v10  ;;  %v1564_v15 = vpack.i.bf16 %v3704_v14, %v3705_v13  ;;  %v3828_v63 = vmov 0 }
   0x6   :  { %1500 = vrot.lane.b32.xlu1 %v1499_v8, %s1809_s20  ;;  %1490 = vrot.lane.b32.xlu0 %v1499_v8, %s1810_s21  ;;  %v20_v20 = vand.u32 255, %v1915_v18  ;;  %v17_v21 = vadd.s32 128, %v1915_v18  ;;  %vm3683_vm3 = vcmp.lt.s32.totalorder %v1915_v18, 112  ;;  %vm3690_vm14 = vcmp.lt.s32.totalorder %v1915_v18, 113 }
   0x7   :  { %1510 = vrot.lane.b32.xlu2 %v1509_v9, %s1810_s21 }
   0x8   :  { %v1921_v22 = vshra.s32 %v20_v20, 4  ;;  %v21_v23 = vand.u32 255, %v17_v21  ;;  %v28_v38 = vand.u32 15, %v20_v20 }
   0xa   :  { %v140_v25 = vadd.s32 1, %v1921_v22  ;;  %v25_v26 = vshra.s32 %v21_v23, 4  ;;  %v29_v27 = vand.u32 15, %v21_v23  ;;  %v1967_v44 = vadd.s32 4294967295, %v28_v38 }
   0xb   :  { %v1995_v54 = vadd.s32 1, %v28_v38  ;;  %v32_v1 = vadd.s32 4294967295, %v1921_v22 }
   0xc   :  { %vm144_vm0 = vcmp.ge.s32.totalorder %v140_v25, 0  ;;  %vm148_vm1 = vcmp.lt.s32.totalorder %v140_v25, 16  ;;  %v141_v28 = vadd.s32 1, %v25_v26  ;;  %v1926_v29 = vadd.s32 4294967295, %v29_v27 }
   0xd   :  { %vm1932_vm2 = vmand %vm144_vm0, %vm148_vm1  ;;  %v1955_v43 = vadd.s32 1, %v29_v27  ;;  %vm105_vm11 = vcmp.ge.s32.totalorder %v25_v26, 0  ;;  %vm109_vm12 = vcmp.lt.s32.totalorder %v25_v26, 16 }
   0xe   :  { %1505 = vrot.lane.b32.xlu1 %v1504_v12, %s1809_s20  ;;  %1495 = vrot.lane.b32.xlu0 %v1504_v12, %s1810_s21  ;;  %v3819_v34 = vsel %vm1932_vm2, 4294967295, %v3818_v34  ;;  %vm145_vm4 = vcmp.ge.s32.totalorder %v141_v28, 0  ;;  %vm149_vm5 = vcmp.lt.s32.totalorder %v141_v28, 16  ;;  %vm3692_vm6 = vcmp.ge.s32.totalorder %v1926_v29, 0  ;;  %vm3682_vm7 = vmpackc.low %vm1932_vm2, %vm1932_vm2 }
   0xf   :  { %1515 = vrot.lane.b32.xlu2 %v1499_v8, %s1811_s0  ;;  %vm1951_vm8 = vmand %vm145_vm4, %vm149_vm5  ;;  %vm3685_vm9 = vcmp.lt.s32.totalorder %v1926_v29, 16  ;;  %vm3684_vm15 = vcmp.ge.s32.totalorder %v1955_v43, 0  ;;  %vm3686_vm4 = vcmp.ge.s32.totalorder %v1967_v44, 0  ;;  %vm104_vm5 = vcmp.ge.s32.totalorder %v1921_v22, 0 }
  0x10   :  { %v3821_v42 = vsel %vm1951_vm8, 4294967295, %v3820_v42  ;;  %vm157_vm10 = vmand %vm1951_vm8, %vm3692_vm6 }
  0x11   :  { %vm1975_vm13 = vmand %vm157_vm10, %vm3685_vm9  ;;  %vm108_vm10 = vcmp.lt.s32.totalorder %v1921_v22, 16 }
  0x12   :  { %v3823_v47 = vsel %vm1975_vm13, 4294967295, %v3822_v47  ;;  %vm1987_vm0 = vmand %vm105_vm11, %vm109_vm12  ;;  %vm3688_vm12 = vcmp.lt.s32.totalorder %v1955_v43, 16 }
  0x13   :  { %v3825_v53 = vsel %vm1987_vm0, 4294967295, %v3824_v53  ;;  %vm3687_vm1 = vmpackc.low %vm1951_vm8, %vm1951_vm8 }
  0x14   :  { %vm3689_vm11 = vmpackc.low %vm1975_vm13, %vm1975_vm13 }
  0x15   :  { %vm2041_vm9 = vmand %vm104_vm5, %vm108_vm10  ;;  %vm3693_vm10 = vcmp.lt.s32.totalorder %v1915_v18, 127 }
  0x16   :  { %1520 = vrot.lane.b32.xlu0 %v1504_v12, %s1811_s0  ;;  %1525 = vrot.lane.b32.xlu1 %v1509_v9, %s1809_s20  ;;  %v3829_v63 = vsel %vm2041_vm9, 4294967295, %v3828_v63 }
  0x17   :  { %1530 = vrot.lane.b32.xlu2 %v1509_v9, %s1811_s0 }
  0x1e   :  { %1535 = vrot.lane.b32.xlu0 %v1509_v9, %s1812_s22  ;;  %1540 = vrot.lane.b32.xlu1 %v1499_v8, %s1812_s22 }
  0x1f   :  { %1545 = vrot.lane.b32.xlu2 %v1499_v8, %s1813_s23 }
  0x26   :  { %1550 = vrot.lane.b32.xlu0 %v1504_v12, %s1813_s23  ;;  %1555 = vrot.lane.b32.xlu1 %v1509_v9, %s1814_s24 }
  0x27   :  { %1560 = vrot.lane.b32.xlu2 %v1499_v8, %s1814_s24 }
  0x2e   :  { %1565 = vrot.lane.b32.xlu0 %v1564_v15, %s1812_s22  ;;  %1570 = vrot.lane.b32.xlu1 %v1509_v9, %s1815_s25 }
  0x2f   :  { %1575 = vrot.lane.b32.xlu2 %v1499_v8, %s1815_s25 }
  0x36   :  { %1580 = vrot.lane.b32.xlu0 %v1509_v9, %s1813_s23  ;;  %1585 = vrot.lane.b32.xlu1 %v1564_v15, %s1814_s24 }
  0x37   :  { %1590 = vrot.lane.b32.xlu2 %v1509_v9, %s1816_s26 }
  0x3e   :  { %1595 = vrot.lane.b32.xlu0 %v1499_v8, %s1816_s26  ;;  %1600 = vrot.lane.b32.xlu1 %v1564_v15, %s1810_s21  ;;  %v33_v8 = vadd.s32 4294967295, %v25_v26 }
  0x3f   :  { %1605 = vrot.lane.b32.xlu2 %v1564_v15, %s1815_s25 }
  0x46   :  { %1610 = vrot.lane.b32.xlu0 %v1564_v15, %s1809_s20  ;;  %1615 = vrot.lane.b32.xlu1 %v1564_v15, %s1816_s26 }
  0x47   :  { %1620 = vrot.lane.b32.xlu2 %v1564_v15, %s1811_s0 }
  0x4e   :  { %1625 = vrot.lane.b32.xlu0 %v1504_v12, %s1812_s22  ;;  %1630 = vrot.lane.b32.xlu1 %v1504_v12, %s1814_s24 }
  0x4f   :  { %1635 = vrot.lane.b32.xlu2 %v1564_v15, %s1813_s23  ;;  %v3830_v15 = vmov 0 }
  0x56   :  { %1640 = vrot.lane.b32.xlu0 %v1504_v12, %s1815_s25  ;;  %1645 = vrot.lane.b32.xlu1 %v1504_v12, %s1816_s26 }
  0x61   :  { %v1913_v16 = vpop.permute.xlu2 %1510 }
  0x62   :  { %v3726_v30 = vunpack.i.h.bf16 %v1913_v16  ;;  %v3727_v31 = vunpack.i.l.bf16 %v1913_v16 }
  0x69   :  { %v1917_v19 = vpop.permute.xlu2 %1515 }
  0x6a   :  { %v1518_v9 = vunpack.i.h.bf16 %v1917_v19  ;;  %v1517_v12 = vunpack.i.l.bf16 %v1917_v19  ;;  %v18_v19 = vadd.s32 256, %v1915_v18 }
  0x71   :  { %v1923_v24 = vpop.permute.xlu2 %1530 }
  0x72   :  { %v3708_v17 = vunpack.i.h.bf16 %v1923_v24  ;;  %v3709_v20 = vunpack.i.l.bf16 %v1923_v24 }
  0x78   :  { %v1930_v32 = vpop.permute.xlu1 %1500  ;;  %v1491_v33 = vpop.permute.xlu0 %1490 }
  0x79   :  { %v1493_v35 = vunpack.i.h.bf16 %v1491_v33  ;;  %v1492_v36 = vunpack.i.l.bf16 %v1491_v33  ;;  %v1937_v37 = vpop.permute.xlu2 %1545  ;;  %v1503_v55 = vunpack.i.h.bf16 %v1930_v32  ;;  %v1502_v56 = vunpack.i.l.bf16 %v1930_v32 }
  0x7b   :  { %v479_v39 = vsel %vm3683_vm3, %v3727_v31, %v1492_v36  ;;  %v480_v40 = vsel %vm3683_vm3, %v3726_v30, %v1493_v35 }
  0x7c   :  { %v1240_v41 = vpack.c.bf16 %v480_v40, %v479_v39 }
  0x7e   :  { %1241 = vmatpush.bf16.msk.msra.mxu0 %vm3682_vm7, %v1240_v41  ;;  %vm133_vm7 = vmand %vm1987_vm0, %vm3684_vm15  ;;  %vm3691_vm15 = vcmp.lt.s32.totalorder %v1995_v54, 16 }
  0x80   :  { %v1969_v45 = vpop.permute.xlu1 %1505  ;;  %v1971_v46 = vpop.permute.xlu0 %1495 }
  0x81   :  { %v3724_v48 = vunpack.i.h.bf16 %v1969_v45  ;;  %v3725_v49 = vunpack.i.l.bf16 %v1969_v45  ;;  %v3728_v50 = vunpack.i.h.bf16 %v1971_v46  ;;  %v3730_v51 = vunpack.i.l.bf16 %v1971_v46  ;;  %v1985_v52 = vpop.permute.xlu2 %1560 }
  0x83   :  { %v477_v57 = vsel %vm3683_vm3, %v1492_v36, %v3730_v51  ;;  %v478_v58 = vsel %vm3683_vm3, %v1493_v35, %v3728_v50  ;;  %v436_v60 = vsel %vm3690_vm14, %v1502_v56, %v3725_v49  ;;  %v437_v61 = vsel %vm3690_vm14, %v1503_v55, %v3724_v48  ;;  %vm2029_vm3 = vmand %vm1932_vm2, %vm3686_vm4 }
  0x84   :  { %v1269_v59 = vpack.c.bf16 %v478_v58, %v477_v57  ;;  %v3827_v62 = vsel %vm2029_vm3, 4294967295, %v3826_v62  ;;  %vm2049_vm4 = vmand %vm133_vm7, %vm3688_vm12  ;;  %v1272_v25 = vpack.c.bf16 %v437_v61, %v436_v60  ;;  %v3832_v35 = vmov 0 }
  0x85   :  { %v3831_v15 = vsel %vm2049_vm4, 4294967295, %v3830_v15  ;;  %vm3695_vm5 = vmpackc.low %vm2029_vm3, %vm2029_vm3  ;;  %vm37_vm12 = vcmp.ge.s32.totalorder %v33_v8, 0  ;;  %v397_v57 = vsel %vm3693_vm10, %v3709_v20, %v1517_v12  ;;  %v398_v58 = vsel %vm3693_vm10, %v3708_v17, %v1518_v9  ;;  %v1227_v17 = vld [vmem:[%s3679_s1 + $0x8] sm:$0xf0] }
  0x86   :  { %1270 = vmatpush.bf16.msk.msra.mxu2 %vm3687_vm1, %v1269_v59  ;;  %vm2073_vm7 = vmand %vm2041_vm9, %vm3691_vm15  ;;  %vm41_vm15 = vcmp.lt.s32.totalorder %v33_v8, 16  ;;  %v1278_v59 = vpack.c.bf16 %v189_v3, %v185_v2  ;;  %v3835_v60 = vmov 0  ;;  %v3837_v61 = vmov 0 }
  0x87   :  { %v3833_v35 = vsel %vm2073_vm7, 4294967295, %v3832_v35  ;;  %vm3694_vm1 = vmpackc.low %vm2049_vm4, %vm2049_vm4  ;;  %v3860_v48 = vmov 0 }
  0x88   :  { %v2055_v21 = vpop.permute.xlu0 %1520  ;;  %v2057_v23 = vpop.permute.xlu1 %1525 }
  0x89   :  { %v3716_v26 = vunpack.i.h.bf16 %v2055_v21  ;;  %v3718_v27 = vunpack.i.l.bf16 %v2055_v21  ;;  %v3712_v28 = vunpack.i.h.bf16 %v2057_v23  ;;  %v3715_v32 = vunpack.i.l.bf16 %v2057_v23  ;;  %v2067_v33 = vpop.permute.xlu2 %1575 }
  0x8a   :  { %1273 = vmatpush.bf16.msk.msra.mxu2 %vm3689_vm11, %v1272_v25  ;;  %vm117_vm11 = vmand %vm1987_vm0, %vm3692_vm6  ;;  %v1246_v25 = vpack.c.bf16 %v398_v58, %v397_v57  ;;  %v3750_v57 = vunpack.i.h.bf16 %v1937_v37  ;;  %v1547_v58 = vunpack.i.l.bf16 %v1937_v37 }
  0x8b   :  { %v438_v36 = vsel %vm3690_vm14, %v3715_v32, %v1502_v56  ;;  %v439_v38 = vsel %vm3690_vm14, %v3712_v28, %v1503_v55  ;;  %v395_v39 = vsel %vm3693_vm10, %v1517_v12, %v3718_v27  ;;  %v396_v40 = vsel %vm3693_vm10, %v1518_v9, %v3716_v26  ;;  %vm2141_vm14 = vmand %vm37_vm12, %vm41_vm15 }
  0x8c   :  { %v1243_v41 = vpack.c.bf16 %v439_v38, %v438_v36  ;;  %v1275_v56 = vpack.c.bf16 %v396_v40, %v395_v39  ;;  %v22_v55 = vand.u32 255, %v18_v19  ;;  %vm3834_vm10 = vcmp.lt.s32.totalorder %v1926_v29, 16  ;;  %vm3841_vm12 = vmpackc.low %vm1987_vm0, %vm1987_vm0 }
  0x8d   :  { %vm2136_vm6 = vmand %vm117_vm11, %vm3834_vm10  ;;  %v3838_v61 = vsel %vm2141_vm14, 4294967295, %v3837_v61  ;;  %vm3842_vm10 = vcmp.ge.s32.totalorder %v1955_v43, 0  ;;  %v1249_v39 = vpack.c.bf16 %v188_v5, %v184_v4  ;;  %v19_v40 = vadd.s32 384, %v1915_v18 }
  0x8e   :  { %1244 = vmatpush.bf16.msk.msra.mxu0 %vm3695_vm5, %v1243_v41  ;;  %1276 = vmatpush.bf16.msk.msra.mxu2 %vm3694_vm1, %v1275_v56  ;;  %v3836_v60 = vsel %vm2136_vm6, 4294967295, %v3835_v60  ;;  %3839 = vst [vmem:[#allocation2_spill] sm:$0xff] %v3838_v61  ;;  %vm3696_vm1 = vcmp.lt.s32.totalorder %v1915_v18, 1  ;;  %v2150_v19 = vshra.s32 %v22_v55, 4  ;;  %vm3699_vm15 = vmpackc.low %vm2136_vm6, %vm2136_vm6  ;;  %v2200_v4 = vand.u32 15, %v22_v55 }
  0x8f   :  { %vm3840_vm11 = vmpackc.low %vm2073_vm7, %vm2073_vm7  ;;  %v23_v22 = vand.u32 255, %v19_v40  ;;  %v3714_v55 = vunpack.i.h.bf16 %v1985_v52  ;;  %vm3717_vm6 = vcmp.lt.s32.totalorder %v1915_v18, 15  ;;  %v3857_v27 = vmov 0 }
  0x90   :  { %v2145_v9 = vpop.permute.xlu0 %1535  ;;  %v2147_v12 = vpop.permute.xlu1 %1540  ;;  %vm93_vm5 = vmand %vm2141_vm14, %vm3842_vm10  ;;  %v142_v5 = vadd.s32 1, %v2150_v19  ;;  %v3893_v61 = vunpack.i.h.bf16 %v1937_v37 }
  0x91   :  { %v1538_v2 = vunpack.i.h.bf16 %v2145_v9  ;;  %v1537_v3 = vunpack.i.l.bf16 %v2145_v9  ;;  %v3706_v36 = vunpack.i.h.bf16 %v2147_v12  ;;  %v3707_v8 = vunpack.i.l.bf16 %v2147_v12  ;;  %v2156_v38 = vpop.permute.xlu2 %1590 }
  0x92   :  { %1247 = vmatpush.bf16.msk.msra.mxu0 %vm3840_vm11, %v1246_v25  ;;  %1279 = vmatpush.bf16.msk.msra.mxu2 %vm3841_vm12, %v1278_v59  ;;  %vm3843_vm12 = vmmov %vm3842_vm10  ;;  %v3845_v59 = vmov 0  ;;  %v3713_v25 = vunpack.i.l.bf16 %v1985_v52  ;;  %v2256_v20 = vshra.s32 %v23_v22, 4  ;;  %vm3859_vm7 = vcmp.ge.s32.totalorder %v142_v5, 0 }
  0x93   :  { %v340_v41 = vsel %vm3696_vm1, %v1537_v3, %v3707_v8  ;;  %v341_v56 = vsel %vm3696_vm1, %v1538_v2, %v3706_v36  ;;  %vm173_vm10 = vmand %vm1951_vm8, %vm3843_vm12  ;;  %vm3844_vm1 = vcmp.lt.s32.totalorder %v1955_v43, 16  ;;  %v1475_v8 = vld [vmem:[%s3679_s1 + $0x4] sm:$0xf]  ;;  %v3877_v9 = vmov 0 }
  0x94   :  { %v1281_v0 = vpack.c.bf16 %v341_v56, %v340_v41  ;;  %vm2212_vm11 = vmand %vm93_vm5, %vm3844_vm1  ;;  %v3850_v41 = vmov 0  ;;  %vm150_vm5 = vcmp.lt.s32.totalorder %v142_v5, 16  ;;  %v2302_v49 = vor.u32 %v1475_v8, %v1227_v17 }
  0x95   :  { %v3846_v59 = vsel %vm2212_vm11, 4294967295, %v3845_v59  ;;  %vm3848_vm12 = vmpackc.low %vm2041_vm9, %vm2041_vm9  ;;  %v3739_v17 = vunpack.i.h.bf16 %v2067_v33 }
  0x96   :  { %1282 = vmatpush.bf16.msk.msra.mxu2 %vm3699_vm15, %v1281_v0  ;;  %3847 = vst [vmem:[#allocation3_spill] sm:$0xff] %v3846_v59  ;;  %1250 = vmatpush.bf16.msk.msra.mxu0 %vm3848_vm12, %v1249_v39  ;;  %vm3849_vm15 = vmmov %vm3844_vm1  ;;  %vm3723_vm1 = vcmp.lt.s32.totalorder %v1915_v18, 111  ;;  %vm40_vm12 = vcmp.lt.s32.totalorder %v32_v1, 16  ;;  %v2236_v39 = vadd.s32 1, %v2200_v4 }
  0x97   :  { %vm2226_vm0 = vmand %vm173_vm10, %vm3849_vm15  ;;  %vm3853_vm10 = vcmp.ge.s32.totalorder %v1967_v44, 0 }
  0x98   :  { %v3851_v41 = vsel %vm2226_vm0, 4294967295, %v3850_v41  ;;  %v2231_v56 = vpop.permute.xlu0 %1550  ;;  %v2233_v0 = vpop.permute.xlu1 %1555  ;;  %vm2286_vm15 = vmand %vm2041_vm9, %vm3853_vm10  ;;  %vm3729_vm13 = vcmp.ge.s32.totalorder %v2236_v39, 0 }
  0x99   :  { %3852 = vst [vmem:[#allocation4_spill] sm:$0xff] %v3851_v41  ;;  %v3733_v40 = vunpack.i.h.bf16 %v2231_v56  ;;  %v3734_v43 = vunpack.i.l.bf16 %v2231_v56  ;;  %v1558_v14 = vunpack.i.h.bf16 %v2233_v0  ;;  %v1557_v13 = vunpack.i.l.bf16 %v2233_v0  ;;  %v2242_v36 = vpop.permute.xlu2 %1605  ;;  %vm3862_vm10 = vmpackc.low %vm2212_vm11, %vm2212_vm11 }
  0x9a   :  { %vm3876_vm11 = vcmp.lt.s32.totalorder %v2236_v39, 16 }
  0x9b   :  { %v299_v11 = vsel %vm3717_vm6, %v1557_v13, %v3713_v25  ;;  %v300_v10 = vsel %vm3717_vm6, %v1558_v14, %v3714_v55  ;;  %v518_v28 = vsel %vm3723_vm1, %v1547_v58, %v3734_v43  ;;  %v519_v25 = vsel %vm3723_vm1, %v3750_v57, %v3733_v40  ;;  %vm2298_vm1 = vmand %vm3859_vm7, %vm150_vm5 }
  0x9c   :  { %v3854_v55 = vmov 0  ;;  %v1284_v32 = vpack.c.bf16 %v300_v10, %v299_v11  ;;  %v1293_v26 = vpack.c.bf16 %v519_v25, %v518_v28  ;;  %vm3856_vm6 = vcmp.ge.s32.totalorder %v32_v1, 0  ;;  %vm2340_vm5 = vmand %vm2298_vm1, %vm3729_vm13 }
  0x9d   :  { %v3855_v55 = vsel %vm2286_vm15, 4294967295, %v3854_v55  ;;  %vm2292_vm4 = vmand %vm3856_vm6, %vm40_vm12  ;;  %v3861_v48 = vsel %vm2298_vm1, 4294967295, %v3860_v48  ;;  %v2317_v10 = vand.u32 15, %v23_v22  ;;  %v143_v11 = vadd.s32 1, %v2256_v20 }
  0x9e   :  { %v3858_v27 = vsel %vm2292_vm4, 4294967295, %v3857_v27  ;;  %1285 = vmatpush.bf16.msk.msra.mxu2 %vm3862_vm10, %v1284_v32  ;;  %vm3863_vm6 = vmpackc.low %vm2226_vm0, %vm2226_vm0  ;;  %v3746_v28 = vunpack.i.l.bf16 %v2067_v33  ;;  %vm3864_vm12 = vcmp.lt.s32.totalorder %v1995_v54, 16  ;;  %v3865_v32 = vmov 0 }
  0x9f   :  { %1294 = vmatpush.bf16.msk.msra.mxu3 %vm3863_vm6, %v1293_v26  ;;  %vm2326_vm10 = vmand %vm2292_vm4, %vm3864_vm12  ;;  %vm3871_vm13 = vcmask 130048   ;;  %v2364_v51 = vadd.s32 1, %v2317_v10  ;;  %vm3874_vm6 = vcmp.lt.s32.totalorder %v1915_v18, 16  ;;  %vm3882_vm3 = vcmp.ge.s32.totalorder %v143_v11, 0 }
  0xa0   :  { %v3866_v32 = vsel %vm2326_vm10, 4294967295, %v3865_v32  ;;  %v2330_v26 = vpop.permute.xlu0 %1565  ;;  %v2332_v8 = vpop.permute.xlu1 %1570  ;;  %vm2354_vm7 = vmand %vm1932_vm2, %vm3864_vm12  ;;  %vm3872_vm12 = vcmp.lt.s32.totalorder %v1915_v18, 1 }
  0xa1   :  { %v3747_v5 = vunpack.i.h.bf16 %v2330_v26  ;;  %v3748_v22 = vunpack.i.l.bf16 %v2330_v26  ;;  %v1573_v25 = vunpack.i.h.bf16 %v2332_v8  ;;  %v1572_v30 = vunpack.i.l.bf16 %v2332_v8  ;;  %v2348_v31 = vpop.permute.xlu2 %1620  ;;  %vm3875_vm0 = vmmov %vm3874_vm6 }
  0xa2   :  { %1295 = vmatmul.msk.bf16.vlgmr.msra.gmra.mxu3 %vm3871_vm13, %v2302_v49  ;;  %vm3873_vm13 = vmmov %vm3872_vm12  ;;  %vm3749_vm8 = vcmp.ge.s32.totalorder %v2364_v51, 0 }
  0xa3   :  { %v342_v54 = vsel %vm3872_vm12, %v3748_v22, %v1537_v3  ;;  %v343_v8 = vsel %vm3873_vm13, %v3747_v5, %v1538_v2  ;;  %v258_v40 = vsel %vm3874_vm6, %v1572_v30, %v3746_v28  ;;  %v259_v43 = vsel %vm3875_vm0, %v1573_v25, %v3739_v17  ;;  %vm2393_vm9 = vmand %vm2340_vm5, %vm3876_vm11 }
  0xa4   :  { %v3878_v9 = vsel %vm2393_vm9, 4294967295, %v3877_v9  ;;  %v1252_v2 = vpack.c.bf16 %v343_v8, %v342_v54  ;;  %v1287_v3 = vpack.c.bf16 %v259_v43, %v258_v40  ;;  %vm151_vm13 = vcmp.lt.s32.totalorder %v143_v11, 16  ;;  %vm3880_vm11 = vmpackc.low %vm2286_vm15, %vm2286_vm15 }
  0xa5   :  { %v2401_v17 = vadd.s32 4294967295, %v2200_v4  ;;  %vm3879_vm0 = vcmp.ge.s32.totalorder %v1926_v29, 0  ;;  %vm3881_vm5 = vmpackc.low %vm2141_vm14, %vm2141_vm14  ;;  %v3883_v4 = vmov 0  ;;  %v3886_v8 = vmov 0 }
  0xa6   :  { %vm57_vm12 = vmand %vm2141_vm14, %vm3879_vm0  ;;  %1253 = vmatpush.bf16.msk.msra.mxu0 %vm3880_vm11, %v1252_v2  ;;  %1288 = vmatpush.bf16.msk.msra.mxu2 %vm3881_vm5, %v1287_v3  ;;  %vm3760_vm0 = vcmp.lt.s32.totalorder %v2364_v51, 16  ;;  %vm3885_vm11 = vcmp.lt.s32.totalorder %v1926_v29, 16 }
  0xa7   :  { %vm2423_vm2 = vmand %vm3882_vm3, %vm151_vm13  ;;  %vm3759_vm6 = vcmp.ge.s32.totalorder %v2401_v17, 0 }
  0xa8   :  { %v3884_v4 = vsel %vm2423_vm2, 4294967295, %v3883_v4  ;;  %v1581_v1 = vpop.permute.xlu0 %1580  ;;  %v2429_v54 = vpop.permute.xlu1 %1585  ;;  %vm2433_vm5 = vmand %vm57_vm12, %vm3885_vm11  ;;  %vm3892_vm11 = vcmp.lt.s32.totalorder %v1915_v18, 111 }
  0xa9   :  { %v3887_v8 = vsel %vm2433_vm5, 4294967295, %v3886_v8  ;;  %v1583_v11 = vunpack.i.h.bf16 %v1581_v1  ;;  %v1582_v2 = vunpack.i.l.bf16 %v1581_v1  ;;  %v3758_v3 = vunpack.i.h.bf16 %v2429_v54  ;;  %v1636_v5 = vpop.permute.xlu2 %1635  ;;  %vm2448_vm12 = vmand %vm2423_vm2, %vm3749_vm8  ;;  %v1477_v1 = vld [vmem:[%s3679_s1 + $0x14] sm:$0xf] }
  0xaa   :  { %v3757_v28 = vunpack.i.l.bf16 %v2429_v54  ;;  %v1638_v29 = vunpack.i.h.bf16 %v1636_v5  ;;  %v1637_v22 = vunpack.i.l.bf16 %v1636_v5  ;;  %v1235_v5 = vld [vmem:[%s3679_s1 + $0x18] sm:$0xf0]  ;;  %vm3890_vm8 = vcmp.lt.s32.totalorder %v1915_v18, 15  ;;  %vm3894_vm3 = vmmov %vm3892_vm11 }
  0xab   :  { %vm3891_vm13 = vmmov %vm3890_vm8  ;;  %v520_v41 = vsel %vm3892_vm11, %v1582_v2, %v1547_v58  ;;  %v521_v59 = vsel %vm3894_vm3, %v1583_v11, %v3893_v61  ;;  %v3899_v61 = vunpack.i.l.bf16 %v2242_v36 }
  0xac   :  { %v301_v43 = vsel %vm3890_vm8, %v3757_v28, %v1557_v13  ;;  %v302_v57 = vsel %vm3891_vm13, %v3758_v3, %v1558_v14  ;;  %v1264_v0 = vpack.c.bf16 %v521_v59, %v520_v41  ;;  %v3895_v28 = vunpack.i.l.bf16 %v2231_v56  ;;  %vm3896_vm13 = vmmov %vm3894_vm3 }
  0xad   :  { %v1255_v13 = vpack.c.bf16 %v302_v57, %v301_v43  ;;  %v3897_v3 = vunpack.i.h.bf16 %v2231_v56  ;;  %vm3898_vm11 = vmmov %vm3894_vm3  ;;  %vm3900_vm8 = vcmp.lt.s32.totalorder %v1915_v18, 16  ;;  %v3901_v59 = vunpack.i.h.bf16 %v2242_v36 }
  0xae   :  { %v516_v14 = vsel %vm3896_vm13, %v3895_v28, %v1637_v22  ;;  %vm158_vm3 = vmand %vm2298_vm1, %vm3759_vm6  ;;  %v260_v57 = vsel %vm3900_vm8, %v3899_v61, %v1572_v30  ;;  %v2511_v28 = vor.u32 %v1477_v1, %v1235_v5  ;;  %vm3907_vm6 = vcmp.ge.s32.totalorder %v1967_v44, 0 }
  0xaf   :  { %v517_v58 = vsel %vm3898_vm11, %v3897_v3, %v1638_v29  ;;  %vm3902_vm13 = vmmov %vm3900_vm8  ;;  %v3908_v30 = vmov 0  ;;  %v3914_v43 = vmov 0  ;;  %v1592_v3 = vunpack.i.l.bf16 %v2156_v38 }
  0xb0   :  { %v1322_v37 = vpack.c.bf16 %v517_v58, %v516_v14  ;;  %v261_v41 = vsel %vm3902_vm13, %v3901_v59, %v1573_v25  ;;  %vm2507_vm11 = vmand %vm2448_vm12, %vm3760_vm0  ;;  %v2532_v25 = vadd.s32 4294967295, %v2317_v10  ;;  %vm3911_vm0 = vcmp.lt.s32.totalorder %v1915_v18, 111  ;;  %v2551_v1 = vpop.permute.xlu0 %1595  ;;  %v1601_v5 = vpop.permute.xlu1 %1600  ;;  %v1476_v58 = vld [vmem:[%s3679_s1 + $0x4] sm:$0xf0] }
  0xb1   :  { %vm3905_vm8 = vmpackc.low %vm2326_vm10, %vm2326_vm10  ;;  %v522_v40 = vsel %vm3911_vm0, %v1637_v22, %v1582_v2  ;;  %v1593_v10 = vunpack.i.h.bf16 %v2156_v38  ;;  %v3768_v2 = vunpack.i.l.bf16 %v2551_v1  ;;  %v1602_v38 = vunpack.i.l.bf16 %v1601_v5 }
  0xb2   :  { %1256 = vmatpush.bf16.msk.msra.mxu0 %vm3905_vm8, %v1255_v13  ;;  %vm3906_vm13 = vmpackc.low %vm2354_vm7, %vm2354_vm7  ;;  %v1258_v13 = vpack.c.bf16 %v261_v41, %v260_v57  ;;  %v3925_v57 = vunpack.i.l.bf16 %v1971_v46  ;;  %v3927_v41 = vunpack.i.h.bf16 %v1971_v46  ;;  %v3930_v46 = vunpack.i.l.bf16 %v1913_v16 }
  0xb3   :  { %1265 = vmatpush.bf16.msk.msra.mxu1 %vm3906_vm13, %v1264_v0  ;;  %vm2527_vm12 = vmand %vm2292_vm4, %vm3907_vm6  ;;  %vm3913_vm6 = vcmp.lt.s32.totalorder %v2401_v17, 16  ;;  %v1225_v0 = vld [vmem:[%s3679_s1] sm:$0xf] }
  0xb4   :  { %v3909_v30 = vsel %vm2527_vm12, 4294967295, %v3908_v30  ;;  %vm3910_vm8 = vmpackc.low %vm2393_vm9, %vm2393_vm9 }
  0xb5   :  { %1323 = vmatpush.bf16.msk.msrb.mxu3 %vm3910_vm8, %v1322_v37  ;;  %vm3912_vm13 = vmmov %vm3911_vm0  ;;  %vm3916_vm0 = vcmp.lt.s32.totalorder %v2150_v19, 16 }
  0xb6   :  { %v523_v44 = vsel %vm3912_vm13, %v1638_v29, %v1583_v11  ;;  %vm2545_vm10 = vmand %vm158_vm3, %vm3913_vm6  ;;  %vm3917_vm13 = vcmp.ge.s32.totalorder %v2150_v19, 0  ;;  %v3767_v11 = vunpack.i.h.bf16 %v2551_v1  ;;  %v1603_v29 = vunpack.i.h.bf16 %v1601_v5 }
  0xb7   :  { %v3915_v43 = vsel %vm2545_vm10, 4294967295, %v3914_v43  ;;  %vm2558_vm14 = vmand %vm3917_vm13, %vm3916_vm0  ;;  %vm3920_vm6 = vcmask 130048   ;;  %v1351_v14 = vpack.c.bf16 %v523_v44, %v522_v40  ;;  %vm3926_vm3 = vcmp.lt.s32.totalorder %v1915_v18, 112 }
  0xb8   :  { %1266 = vmatmul.msk.bf16.vlgmr.msra.gmra.mxu1 %vm3920_vm6, %v2302_v49  ;;  %vm3921_vm0 = vmmov %vm3920_vm6  ;;  %v475_v59 = vsel %vm3926_vm3, %v3925_v57, %v1602_v38  ;;  %v3931_v57 = vunpack.i.h.bf16 %v1913_v16  ;;  %v3937_v16 = vmov 0 }
  0xb9   :  { %1296 = vmatmul.msk.bf16.gmra.mxu3 %vm3921_vm0, %v2511_v28  ;;  %vm3922_vm13 = vmpackc.low %vm2292_vm4, %vm2292_vm4  ;;  %vm3923_vm4 = vcmp.lt.s32.totalorder %v1915_v18, 17  ;;  %vm3933_vm0 = vcmp.ge.s32.totalorder %v2532_v25, 0 }
  0xba   :  { %1259 = vmatpush.bf16.msk.msra.mxu0 %vm3922_vm13, %v1258_v13  ;;  %v217_v37 = vsel %vm3923_vm4, %v1592_v3, %v3768_v2  ;;  %vm3924_vm13 = vmmov %vm3923_vm4  ;;  %v481_v13 = vsel %vm3926_vm3, %v1602_v38, %v3930_v46  ;;  %vm3936_vm4 = vcmp.lt.s32.totalorder %v2236_v39, 16  ;;  %v1623_v38 = vunpack.i.h.bf16 %v2348_v31 }
  0xbb   :  { %v218_v61 = vsel %vm3924_vm13, %v1593_v10, %v3767_v11  ;;  %vm3928_vm8 = vmmov %vm3926_vm3  ;;  %vm3929_vm13 = vcmp.ge.s32.totalorder %v2236_v39, 0  ;;  %v2625_v11 = vor.u32 %v1476_v58, %v1225_v0  ;;  %v1622_v0 = vunpack.i.l.bf16 %v2348_v31  ;;  %v1611_v58 = vpop.permute.xlu0 %1610 }
  0xbc   :  { %v476_v40 = vsel %vm3928_vm8, %v3927_v41, %v1603_v29  ;;  %vm134_vm6 = vmand %vm2558_vm14, %vm3929_vm13  ;;  %v1290_v44 = vpack.c.bf16 %v218_v61, %v217_v37  ;;  %v2663_v37 = vpop.permute.xlu1 %1615  ;;  %v3946_v61 = vmov 0  ;;  %v34_v31 = vadd.s32 4294967295, %v2150_v19 }
  0xbd   :  { %v1298_v5 = vpack.c.bf16 %v476_v40, %v475_v59  ;;  %vm3932_vm8 = vmmov %vm3926_vm3  ;;  %v1612_v59 = vunpack.i.l.bf16 %v1611_v58  ;;  %v1618_v40 = vunpack.i.h.bf16 %v2663_v37 }
  0xbe   :  { %v482_v41 = vsel %vm3932_vm8, %v1603_v29, %v3931_v57  ;;  %vm159_vm9 = vmand %vm2423_vm2, %vm3933_vm0  ;;  %v3942_v29 = vmov 0 }
  0xbf   :  { %v1327_v2 = vpack.c.bf16 %v482_v41, %v481_v13  ;;  %vm3934_vm3 = vmpackc.low %vm2433_vm5, %vm2433_vm5  ;;  %vm3941_vm5 = vcmp.ge.s32.totalorder %v2256_v20, 0  ;;  %v3951_v13 = vunpack.i.l.bf16 %v1969_v45  ;;  %v3953_v41 = vunpack.i.h.bf16 %v1969_v45 }
  0xc0   :  { %1291 = vmatpush.bf16.msk.msra.mxu2 %vm3934_vm3, %v1290_v44  ;;  %vm3935_vm8 = vmpackc.low %vm2298_vm1, %vm2298_vm1  ;;  %vm3940_vm3 = vcmp.lt.s32.totalorder %v2256_v20, 16  ;;  %v1617_v44 = vunpack.i.l.bf16 %v2663_v37  ;;  %v3958_v45 = vunpack.i.h.bf16 %v2055_v21  ;;  %vm3960_vm1 = vcmp.lt.s32.totalorder %v2364_v51, 16 }
  0xc1   :  { %1299 = vmatpush.bf16.msk.msrb.mxu1 %vm3935_vm8, %v1298_v5  ;;  %vm2644_vm13 = vmand %vm134_vm6, %vm3936_vm4  ;;  %vm3945_vm6 = vcmp.lt.s32.totalorder %v2532_v25, 16  ;;  %vm3948_vm8 = vcmp.ge.s32.totalorder %v2364_v51, 0 }
  0xc2   :  { %v3938_v16 = vsel %vm2644_vm13, 4294967295, %v3937_v16  ;;  %vm3939_vm0 = vmpackc.low %vm2507_vm11, %vm2507_vm11 }
  0xc3   :  { %vm2657_vm15 = vmand %vm3941_vm5, %vm3940_vm3  ;;  %647 = vmatmul.bf16.vlgmr.msra.gmra.mxu2 %v2625_v11 }
  0xc4   :  { %1352 = vmatpush.bf16.msk.msrb.mxu2 %vm3939_vm0, %v1351_v14  ;;  %v3943_v29 = vsel %vm2657_vm15, 4294967295, %v3942_v29  ;;  %vm2667_vm4 = vmand %vm159_vm9, %vm3945_vm6  ;;  %v1613_v14 = vunpack.i.h.bf16 %v1611_v58  ;;  %vm3949_vm0 = vcmp.lt.s32.totalorder %v1915_v18, 17  ;;  %vm3952_vm6 = vcmp.lt.s32.totalorder %v1915_v18, 113 }
  0xc5   :  { %3944 = vst [vmem:[#allocation5_spill] sm:$0xff] %v3943_v29  ;;  %v3947_v61 = vsel %vm2667_vm4, 4294967295, %v3946_v61  ;;  %vm135_vm9 = vmand %vm2657_vm15, %vm3948_vm8  ;;  %v219_v5 = vsel %vm3949_vm0, %v1617_v44, %v1592_v3  ;;  %v434_v57 = vsel %vm3952_vm6, %v3951_v13, %v1612_v59 }
  0xc6   :  { %vm3950_vm3 = vmmov %vm3949_vm0  ;;  %vm3955_vm0 = vcmp.ge.s32.totalorder %v2401_v17, 0 }
  0xc7   :  { %v220_v46 = vsel %vm3950_vm3, %v1618_v40, %v1593_v10  ;;  %vm3954_vm8 = vmmov %vm3952_vm6  ;;  %v3956_v10 = vunpack.i.l.bf16 %v2055_v21  ;;  %vm3957_vm6 = vcmp.lt.s32.totalorder %v1915_v18, 127  ;;  %v3965_v21 = vunpack.i.l.bf16 %v2057_v23 }
  0xc8   :  { %v435_v19 = vsel %vm3954_vm8, %v3953_v41, %v1613_v14  ;;  %v1261_v3 = vpack.c.bf16 %v220_v46, %v219_v5  ;;  %vm118_vm3 = vmand %vm2558_vm14, %vm3955_vm0  ;;  %v3961_v5 = vmov 0 }
  0xc9   :  { %v1301_v58 = vpack.c.bf16 %v435_v19, %v434_v57  ;;  %v393_v13 = vsel %vm3957_vm6, %v3956_v10, %v1622_v0  ;;  %vm3959_vm8 = vmmov %vm3957_vm6  ;;  %v3967_v57 = vunpack.i.h.bf16 %v2057_v23  ;;  %v35_v23 = vadd.s32 4294967295, %v2256_v20 }
  0xca   :  { %v394_v41 = vsel %vm3959_vm8, %v3958_v45, %v1623_v38  ;;  %vm2715_vm5 = vmand %vm135_vm9, %vm3960_vm1  ;;  %vm3966_vm8 = vcmp.lt.s32.totalorder %v1915_v18, 113  ;;  %v3977_v20 = vunpack.c.l.bf16 %v1854_v6 }
  0xcb   :  { %v3962_v5 = vsel %vm2715_vm5, 4294967295, %v3961_v5  ;;  %vm3963_vm0 = vmpackc.low %vm2527_vm12, %vm2527_vm12  ;;  %v440_v46 = vsel %vm3966_vm8, %v1612_v59, %v3965_v21  ;;  %vm42_vm12 = vcmp.lt.s32.totalorder %v34_v31, 16  ;;  %v3979_v21 = vunpack.i.l.bf16 %v1923_v24 }
  0xcc   :  { %1262 = vmatpush.bf16.msk.msra.mxu0 %vm3963_vm0, %v1261_v3  ;;  %vm3964_vm6 = vmpackc.low %vm2545_vm10, %vm2545_vm10  ;;  %vm38_vm0 = vcmp.ge.s32.totalorder %v34_v31, 0  ;;  %vm3970_vm10 = vcmp.lt.s32.totalorder %v2401_v17, 16  ;;  %v2752_v3 = vpop.permute.xlu1 %1630  ;;  %vm43_vm9 = vcmp.lt.s32.totalorder %v35_v23, 16 }
  0xcd   :  { %1302 = vmatpush.bf16.msk.msrb.mxu1 %vm3964_vm6, %v1301_v58  ;;  %vm3968_vm1 = vmmov %vm3966_vm8  ;;  %v1304_v58 = vpack.c.bf16 %v394_v41, %v393_v13  ;;  %v3978_v13 = vunpack.c.l.bf16 %v1859_v7 }
  0xce   :  { %v441_v19 = vsel %vm3968_vm1, %v1613_v14, %v3967_v57  ;;  %vm3969_vm6 = vmpackc.low %vm2423_vm2, %vm2423_vm2  ;;  %v1626_v14 = vpop.permute.xlu0 %1625  ;;  %vm3980_vm1 = vcmp.lt.s32.totalorder %v1915_v18, 127  ;;  %v3981_v57 = vunpack.i.h.bf16 %v1923_v24  ;;  %v1633_v24 = vunpack.i.h.bf16 %v2752_v3 }
  0xcf   :  { %vm2747_vm8 = vmand %vm118_vm3, %vm3970_vm10  ;;  %v1628_v31 = vunpack.i.h.bf16 %v1626_v14  ;;  %v1627_v10 = vunpack.i.l.bf16 %v1626_v14  ;;  %609 = vmatmul.bf16.vlgmr.msra.gmra.mxu0 %v2625_v11  ;;  %vm3973_vm10 = vcmask 130048   ;;  %v1307_v41 = vpack.c.bf16 %v3978_v13, %v3977_v20  ;;  %v1233_v14 = vld [vmem:[%s3679_s1 + $0x10] sm:$0xf] }
  0xd0   :  { %1328 = vmatpush.bf16.msk.msrb.mxu0 %vm3969_vm6, %v1327_v2  ;;  %v1330_v2 = vpack.c.bf16 %v441_v19, %v440_v46  ;;  %1267 = vmatmul.msk.bf16.gmra.mxu1 %vm3973_vm10, %v2511_v28  ;;  %vm2760_vm3 = vmand %vm38_vm0, %vm42_vm12  ;;  %v399_v46 = vsel %vm3980_vm1, %v1622_v0, %v3979_v21  ;;  %vm3984_vm0 = vcmp.ge.s32.totalorder %v2236_v39, 0  ;;  %v3987_v21 = vunpack.i.h.bf16 %v2147_v12 }
  0xd1   :  { %vm3976_vm6 = vmpackc.low %vm2644_vm13, %vm2644_vm13  ;;  %1324 = vmatmul.msk.bf16.vlgmr.msrb.gmra.mxu3 %vm3973_vm10, %v2302_v49 }
  0xd2   :  { %1305 = vmatpush.bf16.msk.msrb.mxu1 %vm3976_vm6, %v1304_v58  ;;  %vm3982_vm12 = vmmov %vm3980_vm1  ;;  %v1478_v58 = vld [vmem:[%s3679_s1 + $0x14] sm:$0xf0] }
  0xd3   :  { %v400_v19 = vsel %vm3982_vm12, %v1623_v38, %v3981_v57  ;;  %vm3983_vm1 = vmpackc.low %vm2667_vm4, %vm2667_vm4  ;;  %vm39_vm12 = vcmp.ge.s32.totalorder %v35_v23, 0  ;;  %v1632_v38 = vunpack.i.l.bf16 %v2752_v3  ;;  %v2806_v20 = vor.u32 %v1478_v58, %v1233_v14 }
  0xd4   :  { %1331 = vmatpush.bf16.msk.msrb.mxu0 %vm3983_vm1, %v1330_v2  ;;  %vm94_vm10 = vmand %vm2760_vm3, %vm3984_vm0  ;;  %v1333_v0 = vpack.c.bf16 %v400_v19, %v399_v46  ;;  %v3985_v2 = vunpack.i.l.bf16 %v2147_v12  ;;  %vm3986_vm1 = vcmp.lt.s32.totalorder %v1915_v18, 1  ;;  %vm3989_vm4 = vcmp.ge.s32.totalorder %v2532_v25, 0 }
  0xd5   :  { %vm3988_vm6 = vmmov %vm3986_vm1  ;;  %v3991_v3 = vmov 0  ;;  %v3995_v12 = vunpack.c.h.bf16 %v1854_v6  ;;  %v3996_v46 = vunpack.c.h.bf16 %v1859_v7  ;;  %v4000_v58 = vunpack.i.l.bf16 %v1985_v52  ;;  %652 = vmatmul.bf16.gmra.mxu2 %v2806_v20 }
  0xd6   :  { %v338_v13 = vsel %vm3986_vm1, %v3985_v2, %v1627_v10  ;;  %v339_v23 = vsel %vm3988_vm6, %v3987_v21, %v1628_v31  ;;  %vm119_vm2 = vmand %vm2657_vm15, %vm3989_vm4  ;;  %vm3997_vm4 = vcmp.lt.s32.totalorder %v2236_v39, 16  ;;  %v4005_v7 = vmov 0 }
  0xd7   :  { %vm3990_vm0 = vmpackc.low %vm2558_vm14, %vm2558_vm14  ;;  %v1336_v57 = vpack.c.bf16 %v3996_v46, %v3995_v12  ;;  %v1310_v14 = vpack.c.bf16 %v339_v23, %v338_v13  ;;  %v4008_v13 = vunpack.i.l.bf16 %v2330_v26  ;;  %v1646_v46 = vpop.permute.xlu1 %1645 }
  0xd8   :  { %1308 = vmatpush.bf16.msk.msrb.mxu1 %vm3990_vm0, %v1307_v41  ;;  %vm2825_vm13 = vmand %vm39_vm12, %vm43_vm9  ;;  %v1641_v41 = vpop.permute.xlu0 %1640  ;;  %vm4001_vm9 = vcmp.lt.s32.totalorder %v1915_v18, 15  ;;  %vm4004_vm0 = vcmp.lt.s32.totalorder %v2532_v25, 16 }
  0xd9   :  { %v3992_v3 = vsel %vm2825_vm13, 4294967295, %v3991_v3  ;;  %vm3994_vm6 = vmpackc.low %vm2715_vm5, %vm2715_vm5  ;;  %v297_v2 = vsel %vm4001_vm9, %v4000_v58, %v1632_v38  ;;  %v1643_v39 = vunpack.i.h.bf16 %v1641_v41  ;;  %v1642_v21 = vunpack.i.l.bf16 %v1641_v41 }
  0xda   :  { %3993 = vst [vmem:[#allocation6_spill] sm:$0xff] %v3992_v3  ;;  %1334 = vmatpush.bf16.msk.msrb.mxu0 %vm3994_vm6, %v1333_v0  ;;  %vm2840_vm1 = vmand %vm94_vm10, %vm3997_vm4  ;;  %v4002_v0 = vunpack.i.h.bf16 %v1985_v52  ;;  %vm4009_vm10 = vcmp.lt.s32.totalorder %v1915_v18, 1  ;;  %v4010_v52 = vunpack.i.h.bf16 %v2330_v26  ;;  %v1648_v41 = vunpack.i.h.bf16 %v1646_v46 }
  0xdb   :  { %vm4003_vm12 = vmmov %vm4001_vm9  ;;  %v336_v23 = vsel %vm4009_vm10, %v1627_v10, %v4008_v13  ;;  %vm4012_vm9 = vcmp.ge.s32.totalorder %v2364_v51, 0  ;;  %v4016_v10 = vmov 0  ;;  %v4019_v58 = vunpack.i.l.bf16 %v2067_v33 }
  0xdc   :  { %v298_v6 = vsel %vm4003_vm12, %v4002_v0, %v1633_v24  ;;  %vm2854_vm6 = vmand %vm119_vm2, %vm4004_vm0 }
  0xdd   :  { %v4006_v7 = vsel %vm2854_vm6, 4294967295, %v4005_v7  ;;  %vm4011_vm4 = vmmov %vm4009_vm10  ;;  %v1313_v26 = vpack.c.bf16 %v298_v6, %v297_v2  ;;  %v4026_v2 = vunpack.i.h.bf16 %v2429_v54 }
  0xde   :  { %4007 = vst [vmem:[#allocation7_spill] sm:$0xff] %v4006_v7  ;;  %v337_v12 = vsel %vm4011_vm4, %v1628_v31, %v4010_v52  ;;  %vm95_vm2 = vmand %vm2825_vm13, %vm4012_vm9  ;;  %vm4015_vm9 = vcmp.lt.s32.totalorder %v2364_v51, 16  ;;  %vm4023_vm4 = vcmp.ge.s32.totalorder %v2401_v17, 0  ;;  %v4024_v51 = vunpack.i.l.bf16 %v2429_v54 }
  0xdf   :  { %vm4013_vm12 = vmpackc.low %vm2747_vm8, %vm2747_vm8  ;;  %v1339_v31 = vpack.c.bf16 %v337_v12, %v336_v23  ;;  %614 = vmatmul.bf16.gmra.mxu0 %v2806_v20  ;;  %v4034_v12 = vunpack.i.h.bf16 %v2551_v1 }
  0xe0   :  { %1311 = vmatpush.bf16.msk.msrb.mxu1 %vm4013_vm12, %v1310_v14  ;;  %vm3789_vm0 = vmpackc.low %vm2840_vm1, %vm2840_vm1  ;;  %v1647_v14 = vunpack.i.l.bf16 %v1646_v46  ;;  %vm4020_vm12 = vcmp.lt.s32.totalorder %v1915_v18, 16 }
  0xe1   :  { %vm4014_vm10 = vmpackc.low %vm2657_vm15, %vm2657_vm15  ;;  %v256_v0 = vsel %vm4020_vm12, %v4019_v58, %v1642_v21 }
  0xe2   :  { %1337 = vmatpush.bf16.msk.msrb.mxu0 %vm4014_vm10, %v1336_v57  ;;  %vm2889_vm5 = vmand %vm95_vm2, %vm4015_vm9  ;;  %v4021_v57 = vunpack.i.h.bf16 %v2067_v33  ;;  %vm4029_vm9 = vcmp.lt.s32.totalorder %v2401_v17, 16  ;;  %v4037_v17 = vunpack.i.l.bf16 %v2242_v36 }
  0xe3   :  { %v4017_v10 = vsel %vm2889_vm5, 4294967295, %v4016_v10  ;;  %vm4022_vm10 = vmmov %vm4020_vm12  ;;  %vm4025_vm12 = vcmp.lt.s32.totalorder %v1915_v18, 15 }
  0xe4   :  { %4018 = vst [vmem:[#allocation8_spill] sm:$0xff] %v4017_v10  ;;  %v257_v13 = vsel %vm4022_vm10, %v4021_v57, %v1643_v39  ;;  %vm58_vm2 = vmand %vm2760_vm3, %vm4023_vm4  ;;  %1314 = vmatpush.bf16.msk.msrb.mxu1 %vm3789_vm0, %v1313_v26  ;;  %v295_v33 = vsel %vm4025_vm12, %v1632_v38, %v4024_v51  ;;  %vm4042_vm0 = vcmask 130048  }
  0xe5   :  { %vm4027_vm10 = vmmov %vm4025_vm12  ;;  %v1316_v23 = vpack.c.bf16 %v257_v13, %v256_v0  ;;  %vm4033_vm12 = vcmp.lt.s32.totalorder %v1915_v18, 17  ;;  %1325 = vmatmul.msk.bf16.gmra.mxu3 %vm4042_vm0, %v2511_v28  ;;  %vm4048_vm0 = vcmp.lt.s32.totalorder %v1915_v18, 17 }
  0xe6   :  { %v296_v6 = vsel %vm4027_vm10, %v1633_v24, %v4026_v2  ;;  %vm4028_vm4 = vmpackc.low %vm2854_vm6, %vm2854_vm6  ;;  %v4032_v24 = vunpack.i.l.bf16 %v2551_v1 }
  0xe7   :  { %1340 = vmatpush.bf16.msk.msrb.mxu0 %vm4028_vm4, %v1339_v31  ;;  %vm2931_vm15 = vmand %vm58_vm2, %vm4029_vm9  ;;  %v1342_v54 = vpack.c.bf16 %v296_v6, %v295_v33  ;;  %vm4038_vm9 = vcmp.lt.s32.totalorder %v1915_v18, 16  ;;  %v4039_v31 = vunpack.i.h.bf16 %v2242_v36 }
  0xe8   :  { %v215_v52 = vsel %vm4033_vm12, %v4032_v24, %v1647_v14  ;;  %vm4035_vm10 = vmmov %vm4033_vm12  ;;  %v254_v26 = vsel %vm4038_vm9, %v1642_v21, %v4037_v17  ;;  %vm4041_vm12 = vcmp.ge.s32.totalorder %v2532_v25, 0  ;;  %v213_v21 = vsel %vm4048_vm0, %v1647_v14, %v1617_v44 }
  0xe9   :  { %v216_v46 = vsel %vm4035_vm10, %v4034_v12, %v1648_v41  ;;  %vm4036_vm2 = vmpackc.low %vm2760_vm3, %vm2760_vm3 }
  0xea   :  { %1317 = vmatpush.bf16.msk.msrb.mxu1 %vm4036_vm2, %v1316_v23  ;;  %vm4040_vm4 = vmmov %vm4038_vm9  ;;  %v1319_v36 = vpack.c.bf16 %v216_v46, %v215_v52 }
  0xeb   :  { %v255_v58 = vsel %vm4040_vm4, %v1643_v39, %v4039_v31  ;;  %vm59_vm10 = vmand %vm2825_vm13, %vm4041_vm12  ;;  %vm4044_vm12 = vcmp.lt.s32.totalorder %v2532_v25, 16  ;;  %v4045_v39 = vmov 0 }
  0xec   :  { %vm4043_vm2 = vmpackc.low %vm2889_vm5, %vm2889_vm5  ;;  %v1345_v1 = vpack.c.bf16 %v255_v58, %v254_v26 }
  0xed   :  { %1343 = vmatpush.bf16.msk.msrb.mxu0 %vm4043_vm2, %v1342_v54  ;;  %vm3807_vm9 = vmpackc.low %vm2931_vm15, %vm2931_vm15 }
  0xee   :  { %vm3806_vm4 = vmpackc.low %vm2825_vm13, %vm2825_vm13  ;;  %1320 = vmatpush.bf16.msk.msrb.mxu1 %vm3807_vm9, %v1319_v36 }
  0xef   :  { %vm2976_vm6 = vmand %vm59_vm10, %vm4044_vm12  ;;  %vm4050_vm12 = vcmask 130048  }
  0xf0   :  { %v4046_v39 = vsel %vm2976_vm6, 4294967295, %v4045_v39  ;;  %vm4049_vm2 = vmmov %vm4048_vm0  ;;  %1353 = vmatmul.msk.bf16.vlgmr.msrb.gmra.mxu2 %vm4050_vm12, %v2302_v49 }
  0xf1   :  { %4047 = vst [vmem:[#allocation9_spill] sm:$0xff] %v4046_v39  ;;  %v214_v25 = vsel %vm4049_vm2, %v1648_v41, %v1618_v40  ;;  %1346 = vmatpush.bf16.msk.msrb.mxu0 %vm3806_vm4, %v1345_v1  ;;  %vm3794_vm10 = vmpackc.low %vm2976_vm6, %vm2976_vm6  ;;  %685 = vmatmul.bf16.vlgmr.msrb.gmra.mxu1 %v2625_v11  ;;  %vm4057_vm2 = vcmp.lt.s32.totalorder %v1915_v18, 112 }
  0xf2   :  { %v1348_v0 = vpack.c.bf16 %v214_v25, %v213_v21  ;;  %vm4051_vm0 = vmmov %vm4050_vm12 }
  0xf3   :  { %vm4058_vm12 = vmmov %vm4057_vm2 }
  0xf5   :  { %1349 = vmatpush.bf16.msk.msrb.mxu0 %vm3794_vm10, %v1348_v0 }
  0xf8   :  { %723 = vmatmul.bf16.vlgmr.msrb.gmra.mxu0 %v2625_v11 }
 0x100   :  { %1354 = vmatmul.msk.bf16.gmra.mxu2 %vm4051_vm0, %v2511_v28  ;;  %vm4059_vm0 = vnez %v3819_v34 }
 0x101   :  { %690 = vmatmul.bf16.gmra.mxu1 %v2806_v20  ;;  %vm4060_vm10 = vmpackc.low %vm4059_vm0, %vm4059_vm0 }
 0x102   :  { %vm4064_vm0 = vmmov %vm4058_vm12 }
 0x108   :  { %728 = vmatmul.bf16.gmra.mxu0 %v2806_v20 }
 0x125   :  { %v667_v37 = vpop.f32.mrf.mxu3 }
 0x12d   :  { %v669_v44 = vpop.f32.mrf.mxu3 }
 0x135   :  { %v629_v40 = vpop.f32.mrf.mxu1 }
 0x13c   :  { %v672_v57 = vpop.f32.mrf.mxu3 }
 0x13d   :  { %v631_v41 = vpop.f32.mrf.mxu1 }
 0x144   :  { %v674_v54 = vpop.f32.mrf.mxu3 }
 0x146   :  { %v648_v49 = vpop.f32.mrf.mxu2 }
 0x147   :  { %v668_v23 = vadd.f32 %v667_v37, %v648_v49 }
 0x149   :  { %v754_v20 = vmax.f32 %v668_v23, 0.0 }
 0x14c   :  { %v610_v14 = vpop.f32.mrf.mxu0 }
 0x14d   :  { %v634_v13 = vpop.f32.mrf.mxu1  ;;  %v630_v33 = vadd.f32 %v629_v40, %v610_v14 }
 0x14e   :  { %v650_v51 = vpop.f32.mrf.mxu2 }
 0x14f   :  { %v670_v2 = vadd.f32 %v669_v44, %v650_v51  ;;  %v753_v24 = vmax.f32 %v630_v33, 0.0 }
 0x151   :  { %v758_v28 = vmax.f32 %v670_v2, 0.0 }
 0x153   :  { %v3021_v36 = vpack.c.bf16 %v758_v28, %v754_v20  ;;  %v1684_v49 = vpack.i.bf16 %v758_v28, %v754_v20 }
 0x154   :  { %v612_v6 = vpop.f32.mrf.mxu0  ;;  %v705_v21 = vpop.f32.mrf.mxu3 }
 0x155   :  { %v632_v11 = vadd.f32 %v631_v41, %v612_v6  ;;  %v636_v17 = vpop.f32.mrf.mxu1 }
 0x157   :  { %v757_v52 = vmax.f32 %v632_v11, 0.0 }
 0x158   :  { %v653_v46 = vpop.f32.mrf.mxu2 }
 0x159   :  { %v1669_v12 = vpack.i.bf16 %v757_v52, %v753_v24  ;;  %v3014_v26 = vadd.f32 %v672_v57, %v653_v46  ;;  %v3018_v31 = vpack.c.bf16 %v757_v52, %v753_v24 }
 0x15b   :  { %4052 = vst [vmem:[#allocation10_spill] sm:$0xff] %v3014_v26  ;;  %1670 = vrot.lane.b32.xlu0 %v1669_v12, %s1812_s22  ;;  %1665 = vrot.lane.b32.xlu1 %v1669_v12, %s1811_s0 }
 0x15c   :  { %1650 = vrot.lane.b32.xlu2 %v1669_v12, %s1810_s21  ;;  %v615_v58 = vpop.f32.mrf.mxu0  ;;  %v707_v14 = vpop.f32.mrf.mxu3 }
 0x15d   :  { %v3023_v1 = vadd.f32 %v634_v13, %v615_v58 }
 0x15f   :  { %4053 = vst [vmem:[#allocation11_spill] sm:$0xff] %v3023_v1 }
 0x160   :  { %v655_v25 = vpop.f32.mrf.mxu2 }
 0x161   :  { %v3025_v0 = vadd.f32 %v674_v54, %v655_v25 }
 0x163   :  { %4054 = vst [vmem:[#allocation12_spill] sm:$0xff] %v3025_v0  ;;  %1680 = vrot.lane.b32.xlu0 %v1669_v12, %s1815_s25  ;;  %1675 = vrot.lane.b32.xlu1 %v1669_v12, %s1814_s24 }
 0x164   :  { %1655 = vrot.lane.b32.xlu2 %v1669_v12, %s1809_s20  ;;  %v617_v37 = vpop.f32.mrf.mxu0 }
 0x165   :  { %v3030_v44 = vadd.f32 %v636_v17, %v617_v37 }
 0x167   :  { %4055 = vst [vmem:[#allocation13_spill] sm:$0xff] %v3030_v44 }
 0x16b   :  { %1685 = vrot.lane.b32.xlu0 %v1684_v49, %s1810_s21  ;;  %1705 = vrot.lane.b32.xlu1 %v1684_v49, %s1812_s22 }
 0x16c   :  { %1660 = vrot.lane.b32.xlu2 %v1669_v12, %s1813_s23 }
 0x16e   :  { %v686_v40 = vpop.f32.mrf.mxu1 }
 0x16f   :  { %v706_v41 = vadd.f32 %v705_v21, %v686_v40 }
 0x171   :  { %v755_v33 = vmax.f32 %v706_v41, 0.0 }
 0x173   :  { %v743_v57 = vpop.f32.mrf.mxu2  ;;  %1690 = vrot.lane.b32.xlu0 %v1684_v49, %s1809_s20 }
 0x174   :  { %1700 = vrot.lane.b32.xlu2 %v1684_v49, %s1811_s0 }
 0x175   :  { %v724_v51 = vpop.f32.mrf.mxu0 }
 0x176   :  { %v688_v13 = vpop.f32.mrf.mxu1  ;;  %v744_v52 = vadd.f32 %v743_v57, %v724_v51 }
 0x177   :  { %v708_v2 = vadd.f32 %v707_v14, %v688_v13 }
 0x178   :  { %v756_v20 = vmax.f32 %v744_v52, 0.0 }
 0x179   :  { %v759_v6 = vmax.f32 %v708_v2, 0.0 }
 0x17b   :  { %v1714_v11 = vpack.i.bf16 %v759_v6, %v755_v33  ;;  %v745_v23 = vpop.f32.mrf.mxu2  ;;  %v3037_v54 = vpack.c.bf16 %v759_v6, %v755_v33  ;;  %1695 = vrot.lane.b32.xlu0 %v1684_v49, %s1813_s23 }
 0x17c   :  { %1710 = vrot.lane.b32.xlu2 %v1684_v49, %s1814_s24 }
 0x17d   :  { %1715 = vrot.lane.b32.xlu1 %v1714_v11, %s1810_s21  ;;  %v726_v24 = vpop.f32.mrf.mxu0 }
 0x17e   :  { %v746_v28 = vadd.f32 %v745_v23, %v726_v24 }
 0x180   :  { %v760_v46 = vmax.f32 %v746_v28, 0.0 }
 0x182   :  { %v3042_v17 = vpack.c.bf16 %v760_v46, %v756_v20  ;;  %v1754_v58 = vpack.i.bf16 %v760_v46, %v756_v20 }
 0x183   :  { %1725 = vrot.lane.b32.xlu0 %v1714_v11, %s1811_s0 }
 0x184   :  { %4056 = vst [vmem:[#allocation14_spill] sm:$0xff] %v3042_v17  ;;  %1755 = vrot.lane.b32.xlu2 %v1754_v58, %s1809_s20 }
 0x185   :  { %1720 = vrot.lane.b32.xlu1 %v1714_v11, %s1809_s20 }
 0x18b   :  { %1745 = vrot.lane.b32.xlu0 %v1714_v11, %s1812_s22 }
 0x18c   :  { %1760 = vrot.lane.b32.xlu2 %v1754_v58, %s1812_s22 }
 0x18d   :  { %1730 = vrot.lane.b32.xlu1 %v1714_v11, %s1813_s23 }
 0x193   :  { %1765 = vrot.lane.b32.xlu0 %v1754_v58, %s1811_s0 }
 0x194   :  { %1775 = vrot.lane.b32.xlu2 %v1754_v58, %s1813_s23 }
 0x195   :  { %1735 = vrot.lane.b32.xlu1 %v1754_v58, %s1810_s21 }
 0x19b   :  { %1770 = vrot.lane.b32.xlu0 %v1754_v58, %s1814_s24 }
 0x19c   :  { %1780 = vrot.lane.b32.xlu2 %v1754_v58, %s1815_s25 }
 0x19d   :  { %1740 = vrot.lane.b32.xlu1 %v1684_v49, %s1815_s25 }
 0x1a3   :  { %1790 = vrot.lane.b32.xlu0 %v1754_v58, %s1816_s26 }
 0x1a4   :  { %1785 = vrot.lane.b32.xlu2 %v1684_v49, %s1816_s26 }
 0x1a5   :  { %1750 = vrot.lane.b32.xlu1 %v1669_v12, %s1816_s26 }
 0x1ab   :  { %1805 = vrot.lane.b32.xlu0 %v1714_v11, %s1816_s26 }
 0x1ac   :  { %1800 = vrot.lane.b32.xlu2 %v1714_v11, %s1815_s25 }
 0x1ad   :  { %1795 = vrot.lane.b32.xlu1 %v1714_v11, %s1814_s24 }
 0x1b6   :  { %v3062_v21 = vpop.permute.xlu2 %1650 }
 0x1b7   :  { %v3796_v33 = vunpack.i.h.bf16 %v3062_v21  ;;  %v3795_v2 = vunpack.i.l.bf16 %v3062_v21 }
 0x1be   :  { %v3064_v25 = vpop.permute.xlu2 %1655 }
 0x1bf   :  { %v3801_v46 = vunpack.i.l.bf16 %v3064_v25  ;;  %v4062_v58 = vunpack.i.h.bf16 %v3064_v25 }
 0x1c6   :  { %v3066_v37 = vpop.permute.xlu2 %1660 }
 0x1cd   :  { %v3068_v40 = vpop.permute.xlu0 %1670  ;;  %v3070_v12 = vpop.permute.xlu1 %1665 }
 0x1ce   :  { %v3072_v41 = vpop.permute.xlu2 %1700 }
 0x1cf   :  { %v1702_v0 = vunpack.i.l.bf16 %v3072_v41  ;;  %v4065_v3 = vunpack.i.h.bf16 %v3072_v41 }
 0x1d5   :  { %v3074_v14 = vpop.permute.xlu0 %1680  ;;  %v3076_v57 = vpop.permute.xlu1 %1675 }
 0x1d6   :  { %v3078_v49 = vpop.permute.xlu2 %1710 }
 0x1dd   :  { %v1686_v13 = vpop.permute.xlu0 %1685  ;;  %v3080_v51 = vpop.permute.xlu1 %1705 }
 0x1de   :  { %v1688_v6 = vunpack.i.h.bf16 %v1686_v13  ;;  %v1687_v11 = vunpack.i.l.bf16 %v1686_v13  ;;  %v3084_v23 = vpop.permute.xlu2 %1755 }
 0x1e0   :  { %v983_v24 = vsel %vm4057_vm2, %v3795_v2, %v1687_v11  ;;  %v984_v52 = vsel %vm4058_vm12, %v3796_v33, %v1688_v6 }
 0x1e1   :  { %v1364_v28 = vpack.c.bf16 %v984_v52, %v983_v24 }
 0x1e3   :  { %1365 = vmatpush.bf16.msk.msra.mxu1 %vm4060_vm10, %v1364_v28  ;;  %vm4061_vm10 = vcmp.lt.s32.totalorder %v1915_v18, 113 }
 0x1e4   :  { %vm4063_vm2 = vmmov %vm4061_vm10 }
 0x1e5   :  { %v1691_v33 = vpop.permute.xlu0 %1690 }
 0x1e6   :  { %v1693_v52 = vunpack.i.h.bf16 %v1691_v33  ;;  %v1692_v26 = vunpack.i.l.bf16 %v1691_v33  ;;  %v3109_v20 = vpop.permute.xlu2 %1760 }
 0x1e7   :  { %v4192_v38 = vunpack.i.h.bf16 %v3109_v20 }
 0x1e8   :  { %v951_v13 = vsel %vm4061_vm10, %v3801_v46, %v1692_v26  ;;  %v952_v2 = vsel %vm4063_vm2, %v4062_v58, %v1693_v52  ;;  %v4066_v46 = vunpack.i.h.bf16 %v3070_v12  ;;  %vm4067_vm10 = vcmp.lt.s32.totalorder %v1915_v18, 127 }
 0x1e9   :  { %v1367_v1 = vpack.c.bf16 %v952_v2, %v951_v13  ;;  %v4068_v58 = vunpack.i.l.bf16 %v3070_v12  ;;  %vm4069_vm2 = vmmov %vm4067_vm10 }
 0x1ea   :  { %v920_v10 = vsel %vm4067_vm10, %v4066_v46, %v4065_v3  ;;  %v1662_v3 = vunpack.i.l.bf16 %v3066_v37  ;;  %vm4076_vm10 = vcmp.lt.s32.totalorder %v1915_v18, 111 }
 0x1eb   :  { %v919_v7 = vsel %vm4069_vm2, %v4068_v58, %v1702_v0  ;;  %vm4077_vm2 = vmmov %vm4076_vm10 }
 0x1ec   :  { %v1370_v2 = vpack.c.bf16 %v920_v10, %v919_v7  ;;  %v1479_v7 = vld [vmem:[%s3680_s2 + $0x4] sm:$0xf]  ;;  %v1359_v10 = vld [vmem:[%s3680_s2 + $0x8] sm:$0xf0] }
 0x1ed   :  { %v3151_v46 = vpop.permute.xlu0 %1695  ;;  %v3196_v17 = vor.u32 %v1479_v7, %v1359_v10 }
 0x1ee   :  { %v3810_v13 = vunpack.i.l.bf16 %v3151_v46 }
 0x1ef   :  { %v3105_v24 = vpop.permute.xlu1 %1715 }
 0x1f0   :  { %v3809_v34 = vunpack.i.h.bf16 %v3105_v24  ;;  %v3808_v28 = vunpack.i.l.bf16 %v3105_v24  ;;  %v1015_v58 = vsel %vm4076_vm10, %v1662_v3, %v3810_v13  ;;  %vm4082_vm10 = vnez %v3829_v63 }
 0x1f2   :  { %v982_v33 = vsel %vm4058_vm12, %v1688_v6, %v3809_v34  ;;  %v981_v44 = vsel %vm4064_vm0, %v1687_v11, %v3808_v28  ;;  %vm4070_vm12 = vnez %v3827_v62  ;;  %vm4072_vm0 = vnez %v3821_v42  ;;  %v1776_v28 = vpop.permute.xlu2 %1775 }
 0x1f3   :  { %v1392_v39 = vpack.c.bf16 %v982_v33, %v981_v44  ;;  %vm4071_vm4 = vmpackc.low %vm4070_vm12, %vm4070_vm12  ;;  %v1663_v44 = vunpack.i.h.bf16 %v3066_v37  ;;  %v3814_v6 = vunpack.i.h.bf16 %v3109_v20  ;;  %v3815_v11 = vunpack.i.l.bf16 %v3109_v20 }
 0x1f4   :  { %1368 = vmatpush.bf16.msk.msra.mxu1 %vm4071_vm4, %v1367_v1  ;;  %vm4073_vm9 = vmpackc.low %vm4072_vm0, %vm4072_vm0  ;;  %v3811_v1 = vunpack.i.h.bf16 %v3151_v46  ;;  %v1673_v33 = vunpack.i.h.bf16 %v3068_v40  ;;  %v1672_v37 = vunpack.i.l.bf16 %v3068_v40  ;;  %vm4078_vm12 = vcmp.lt.s32.totalorder %v1915_v18, 113 }
 0x1f5   :  { %1393 = vmatpush.bf16.msk.msra.mxu0 %vm4073_vm9, %v1392_v39  ;;  %vm4074_vm9 = vnez %v3833_v35  ;;  %vm4079_vm0 = vmmov %vm4078_vm12  ;;  %v1726_v10 = vpop.permute.xlu0 %1725 }
 0x1f6   :  { %vm4075_vm4 = vmpackc.low %vm4074_vm9, %vm4074_vm9  ;;  %v1016_v35 = vsel %vm4077_vm2, %v1663_v44, %v3811_v1  ;;  %vm4080_vm9 = vcmp.lt.s32.totalorder %v1915_v18, 1  ;;  %v1728_v63 = vunpack.i.h.bf16 %v1726_v10 }
 0x1f7   :  { %v3153_v62 = vpop.permute.xlu1 %1720  ;;  %v1388_v34 = vpack.c.bf16 %v1016_v35, %v1015_v58  ;;  %v882_v13 = vsel %vm4080_vm9, %v3814_v6, %v1673_v33  ;;  %vm4083_vm2 = vmpackc.low %vm4082_vm10, %vm4082_vm10  ;;  %v1727_v35 = vunpack.i.l.bf16 %v1726_v10  ;;  %vm4089_vm10 = vnez %v3855_v55  ;;  %v4129_v6 = vld [vmem:[#allocation2_spill] sm:$0xff] }
 0x1f8   :  { %v1723_v42 = vunpack.i.h.bf16 %v3153_v62  ;;  %v1722_v39 = vunpack.i.l.bf16 %v3153_v62  ;;  %1371 = vmatpush.bf16.msk.msra.mxu1 %vm4075_vm4, %v1370_v2  ;;  %vm4081_vm4 = vmmov %vm4080_vm9 }
 0x1f9   :  { %v881_v1 = vsel %vm4081_vm4, %v3815_v11, %v1672_v37  ;;  %vm4088_vm4 = vcmp.lt.s32.totalorder %v1915_v18, 111 }
 0x1fa   :  { %v950_v2 = vsel %vm4078_vm12, %v1693_v52, %v1723_v42  ;;  %v949_v40 = vsel %vm4079_vm0, %v1692_v26, %v1722_v39  ;;  %v1778_v52 = vunpack.i.h.bf16 %v1776_v28  ;;  %vm4084_vm12 = vmpackc.low %vm2354_vm7, %vm2354_vm7  ;;  %v1777_v26 = vunpack.i.l.bf16 %v1776_v28 }
 0x1fb   :  { %v1395_v29 = vpack.c.bf16 %v950_v2, %v949_v40  ;;  %1389 = vmatpush.bf16.msk.msra.mxu3 %vm4084_vm12, %v1388_v34  ;;  %vm4085_vm0 = vnez %v3823_v47  ;;  %v1376_v7 = vpack.c.bf16 %v882_v13, %v881_v1  ;;  %vm4087_vm7 = vcmask 130048   ;;  %vm4091_vm12 = vmmov %vm4088_vm4 }
 0x1fc   :  { %1374 = vmatpush.bf16.msk.msra.mxu1 %vm4083_vm2, %v3018_v31  ;;  %vm4086_vm9 = vmpackc.low %vm4085_vm0, %vm4085_vm0  ;;  %v1018_v50 = vsel %vm4088_vm4, %v1778_v52, %v1663_v44  ;;  %v1017_v47 = vsel %vm4091_vm12, %v1777_v26, %v1662_v3  ;;  %vm4092_vm0 = vcmp.lt.s32.totalorder %v1915_v18, 127  ;;  %v4093_v34 = vunpack.i.h.bf16 %v3072_v41 }
 0x1fd   :  { %1396 = vmatpush.bf16.msk.msra.mxu0 %vm4086_vm9, %v1395_v29  ;;  %vm4090_vm2 = vmpackc.low %vm4089_vm10, %vm4089_vm10  ;;  %v917_v29 = vsel %vm4092_vm0, %v1702_v0, %v1727_v35  ;;  %v1708_v3 = vunpack.i.h.bf16 %v3080_v51  ;;  %v1707_v0 = vunpack.i.l.bf16 %v3080_v51  ;;  %v1472_v41 = vpack.c.bf16 %v1018_v50, %v1017_v47 }
 0x1fe   :  { %1390 = vmatmul.msk.bf16.vlgmr.msra.gmra.mxu3 %vm4087_vm7, %v3196_v17  ;;  %vm4094_vm9 = vmmov %vm4092_vm0  ;;  %vm4096_vm10 = vnez %v3831_v15  ;;  %vm4098_vm12 = vnez %v3878_v9  ;;  %v1678_v40 = vunpack.i.h.bf16 %v3076_v57  ;;  %v3264_v15 = vpop.permute.xlu0 %1745 }
 0x1ff   :  { %v3214_v58 = vpop.permute.xlu1 %1730  ;;  %v918_v28 = vsel %vm4094_vm9, %v4093_v34, %v1728_v63  ;;  %vm4095_vm7 = vmmov %vm4088_vm4  ;;  %v4106_v34 = vunpack.i.h.bf16 %v3105_v24 }
 0x200   :  { %v1733_v31 = vunpack.i.h.bf16 %v3214_v58  ;;  %v1732_v2 = vunpack.i.l.bf16 %v3214_v58  ;;  %1377 = vmatpush.bf16.msk.msra.mxu1 %vm4090_vm2, %v1376_v7  ;;  %v1398_v1 = vpack.c.bf16 %v918_v28, %v917_v29  ;;  %vm4097_vm2 = vmpackc.low %vm4096_vm10, %vm4096_vm10  ;;  %v1712_v7 = vunpack.i.l.bf16 %v3078_v49  ;;  %v3284_v29 = vpop.permute.xlu2 %1780  ;;  %v1480_v58 = vld [vmem:[%s3680_s2 + $0x4] sm:$0xf0] }
 0x201   :  { %vm4099_vm0 = vmpackc.low %vm4098_vm12, %vm4098_vm12  ;;  %vm4107_vm12 = vcmp.lt.s32.totalorder %v1915_v18, 112 }
 0x202   :  { %v1011_v44 = vsel %vm4095_vm7, %v1732_v2, %v1777_v26  ;;  %v1012_v55 = vsel %vm4088_vm4, %v1733_v31, %v1778_v52  ;;  %1399 = vmatpush.bf16.msk.msra.mxu0 %vm4097_vm2, %v1398_v1  ;;  %v1677_v52 = vunpack.i.l.bf16 %v3076_v57  ;;  %v1713_v26 = vunpack.i.h.bf16 %v3078_v49  ;;  %vm4100_vm9 = vmpackc.low %vm2507_vm11, %vm2507_vm11 }
 0x203   :  { %v1444_v13 = vpack.c.bf16 %v1012_v55, %v1011_v44  ;;  %vm4101_vm7 = vcmp.lt.s32.totalorder %v1915_v18, 1  ;;  %vm4103_vm11 = vnez %v3825_v53  ;;  %vm4105_vm2 = vcmp.lt.s32.totalorder %v1915_v18, 15 }
 0x204   :  { %v880_v9 = vsel %vm4101_vm7, %v1673_v33, %v1708_v3  ;;  %vm4102_vm4 = vmmov %vm4101_vm7  ;;  %v848_v33 = vsel %vm4105_vm2, %v1678_v40, %v1713_v26  ;;  %v1757_v44 = vunpack.i.l.bf16 %v3084_v23  ;;  %v4109_v1 = vunpack.i.l.bf16 %v3105_v24 }
 0x205   :  { %1445 = vmatpush.bf16.msk.msrb.mxu3 %vm4099_vm0, %v1444_v13  ;;  %v879_v50 = vsel %vm4102_vm4, %v1672_v37, %v1707_v0  ;;  %vm4104_vm10 = vmpackc.low %vm4103_vm11, %vm4103_vm11  ;;  %vm4111_vm7 = vnez %v3836_v60  ;;  %vm4113_vm11 = vcmp.lt.s32.totalorder %v1915_v18, 113  ;;  %v4168_v49 = vunpack.i.h.bf16 %v3064_v25 }
 0x206   :  { %1402 = vmatpush.bf16.msk.msra.mxu0 %vm4104_vm10, %v3021_v36  ;;  %v1404_v37 = vpack.c.bf16 %v880_v9, %v879_v50  ;;  %vm4108_vm0 = vmmov %vm4105_vm2  ;;  %v1758_v36 = vunpack.i.h.bf16 %v3084_v23  ;;  %vm4115_vm2 = vnez %v3861_v48  ;;  %v3334_v60 = vpop.permute.xlu0 %1765  ;;  %v1683_v48 = vunpack.i.h.bf16 %v3074_v14 }
 0x207   :  { %v3266_v10 = vpop.permute.xlu1 %1735  ;;  %v847_v53 = vsel %vm4108_vm0, %v1677_v52, %v1712_v7  ;;  %vm4112_vm4 = vmpackc.low %vm4111_vm7, %vm4111_vm7  ;;  %vm4117_vm0 = vcmask 130048  }
 0x208   :  { %v1738_v47 = vunpack.i.h.bf16 %v3266_v10  ;;  %v1737_v56 = vunpack.i.l.bf16 %v3266_v10  ;;  %vm4114_vm10 = vmmov %vm4113_vm11  ;;  %v1407_v9 = vpack.c.bf16 %v848_v33, %v847_v53 }
 0x209   :  { %1473 = vmatpush.bf16.msk.msra.mxu3 %vm4100_vm9, %v1472_v41  ;;  %vm4110_vm9 = vmmov %vm4107_vm12  ;;  %v947_v41 = vsel %vm4113_vm11, %v1722_v39, %v1757_v44  ;;  %v948_v24 = vsel %vm4114_vm10, %v1723_v42, %v1758_v36  ;;  %v3817_v39 = vunpack.i.h.bf16 %v3334_v60  ;;  %vm4123_vm10 = vnez %v3915_v43 }
 0x20a   :  { %v980_v28 = vsel %vm4107_vm12, %v4106_v34, %v1738_v47  ;;  %v979_v55 = vsel %vm4110_vm9, %v4109_v1, %v1737_v56  ;;  %1405 = vmatpush.bf16.msk.msra.mxu0 %vm4112_vm4, %v1404_v37  ;;  %vm4116_vm12 = vmpackc.low %vm4115_vm2, %vm4115_vm2  ;;  %v3816_v37 = vunpack.i.l.bf16 %v3334_v60  ;;  %v1423_v42 = vpack.c.bf16 %v948_v24, %v947_v41  ;;  %v4118_v34 = vld [vmem:[#allocation3_spill] sm:$0xff] }
 0x20b   :  { %v1420_v13 = vpack.c.bf16 %v980_v28, %v979_v55  ;;  %vm4119_vm9 = vnez %v4118_v34  ;;  %vm4121_vm4 = vcmp.lt.s32.totalorder %v1915_v18, 127  ;;  %v1682_v1 = vunpack.i.l.bf16 %v3074_v14  ;;  %vm4124_vm2 = vmpackc.low %vm4123_vm10, %vm4123_vm10 }
 0x20c   :  { %vm4120_vm7 = vmpackc.low %vm4119_vm9, %vm4119_vm9  ;;  %v916_v28 = vsel %vm4121_vm4, %v1728_v63, %v3817_v39  ;;  %v1748_v41 = vunpack.i.h.bf16 %v3264_v15  ;;  %v1783_v43 = vunpack.i.h.bf16 %v3284_v29  ;;  %vm4127_vm9 = vnez %v3938_v16 }
 0x20d   :  { %1421 = vmatpush.bf16.msk.msra.mxu2 %vm4116_vm12, %v1420_v13  ;;  %vm4122_vm11 = vmmov %vm4121_vm4  ;;  %v3364_v13 = vpop.permute.xlu2 %1785  ;;  %vm4125_vm12 = vcmp.lt.s32.totalorder %v1915_v18, 16  ;;  %vm4130_vm4 = vnez %v4129_v6  ;;  %v4132_v16 = vunpack.i.h.bf16 %v3151_v46  ;;  %vm4133_vm10 = vcmp.lt.s32.totalorder %v1915_v18, 111 }
 0x20e   :  { %1446 = vmatmul.msk.bf16.vlgmr.msrb.gmra.mxu3 %vm4117_vm0, %v3196_v17  ;;  %1408 = vmatpush.bf16.msk.msra.mxu0 %vm4120_vm7, %v1407_v9  ;;  %v915_v53 = vsel %vm4122_vm11, %v1727_v35, %v3816_v37  ;;  %v1747_v35 = vunpack.i.l.bf16 %v3264_v15  ;;  %vm4126_vm0 = vmmov %vm4125_vm12  ;;  %v1782_v9 = vunpack.i.l.bf16 %v3284_v29  ;;  %v1787_v34 = vunpack.i.l.bf16 %v3364_v13  ;;  %v4200_v15 = vld [vmem:[#allocation7_spill] sm:$0xff] }
 0x20f   :  { %v3336_v50 = vpop.permute.xlu1 %1740  ;;  %v1426_v55 = vpack.c.bf16 %v916_v28, %v915_v53  ;;  %vm4128_vm7 = vmpackc.low %vm4127_vm9, %vm4127_vm9  ;;  %v3385_v28 = vpop.permute.xlu0 %1770  ;;  %v4134_v39 = vunpack.i.l.bf16 %v3151_v46  ;;  %v1357_v46 = vld [vmem:[%s3680_s2] sm:$0xf]  ;;  %vm4138_vm9 = vcmp.lt.s32.totalorder %v1915_v18, 15 }
 0x210   :  { %v1743_v62 = vunpack.i.h.bf16 %v3336_v50  ;;  %v1742_v33 = vunpack.i.l.bf16 %v3336_v50  ;;  %vm4131_vm11 = vmpackc.low %vm4130_vm4, %vm4130_vm4  ;;  %vm4140_vm4 = vcmp.lt.s32.totalorder %v1915_v18, 17 }
 0x211   :  { %1424 = vmatpush.bf16.msk.msra.mxu2 %vm4124_vm2, %v1423_v42  ;;  %v1788_v42 = vunpack.i.h.bf16 %v3364_v13  ;;  %vm4135_vm2 = vmmov %vm4133_vm10  ;;  %v4194_v13 = vld [vmem:[#allocation14_spill] sm:$0xff] }
 0x212   :  { %v816_v63 = vsel %vm4125_vm12, %v1683_v48, %v1743_v62  ;;  %v815_v14 = vsel %vm4126_vm0, %v1682_v1, %v1742_v33  ;;  %v1013_v6 = vsel %vm4135_vm2, %v4134_v39, %v1732_v2  ;;  %vm4136_vm12 = vcmp.lt.s32.totalorder %v1915_v18, 1 }
 0x213   :  { %v1410_v24 = vpack.c.bf16 %v816_v63, %v815_v14  ;;  %v1773_v63 = vunpack.i.h.bf16 %v3385_v28  ;;  %v1772_v14 = vunpack.i.l.bf16 %v3385_v28  ;;  %vm4137_vm0 = vmmov %vm4136_vm12  ;;  %vm4143_vm2 = vcmp.lt.s32.totalorder %v1915_v18, 16 }
 0x215   :  { %1427 = vmatpush.bf16.msk.msra.mxu2 %vm4128_vm7, %v1426_v55  ;;  %1411 = vmatpush.bf16.msk.msra.mxu0 %vm4131_vm11, %v1410_v24  ;;  %v1014_v55 = vsel %vm4133_vm10, %v4132_v16, %v1733_v31  ;;  %v877_v24 = vsel %vm4136_vm12, %v1707_v0, %v1747_v35  ;;  %v878_v31 = vsel %vm4137_vm0, %v1708_v3, %v1748_v41  ;;  %vm4139_vm7 = vmmov %vm4138_vm9  ;;  %v1801_v22 = vpop.permute.xlu2 %1800 }
 0x216   :  { %v850_v2 = vsel %vm4138_vm9, %v1773_v63, %v1678_v40  ;;  %v849_v51 = vsel %vm4139_vm7, %v1772_v14, %v1677_v52  ;;  %vm4141_vm11 = vmmov %vm4140_vm4  ;;  %v1416_v57 = vpack.c.bf16 %v1014_v55, %v1013_v6  ;;  %v818_v40 = vsel %vm4143_vm2, %v1783_v43, %v1683_v48 }
 0x217   :  { %v1751_v53 = vpop.permute.xlu1 %1750  ;;  %v1379_v39 = vpack.c.bf16 %v850_v2, %v849_v51  ;;  %vm4142_vm10 = vmpackc.low %vm2558_vm14, %vm2558_vm14  ;;  %v3458_v16 = vor.u32 %v1480_v58, %v1357_v46  ;;  %v1432_v2 = vpack.c.bf16 %v878_v31, %v877_v24  ;;  %vm4145_vm0 = vnez %v3866_v32  ;;  %v1791_v32 = vpop.permute.xlu0 %1790 }
 0x218   :  { %v1753_v11 = vunpack.i.h.bf16 %v1751_v53  ;;  %v1752_v37 = vunpack.i.l.bf16 %v1751_v53  ;;  %vm4144_vm12 = vmmov %vm4143_vm2  ;;  %vm4147_vm9 = vnez %v3887_v8  ;;  %v1793_v55 = vunpack.i.h.bf16 %v1791_v32 }
 0x219   :  { %1430 = vmatpush.bf16.msk.msra.mxu2 %vm4142_vm10, %v3037_v54  ;;  %v817_v52 = vsel %vm4144_vm12, %v1782_v9, %v1682_v1  ;;  %vm4146_vm14 = vmpackc.low %vm4145_vm0, %vm4145_vm0  ;;  %v4149_v54 = vld [vmem:[#allocation4_spill] sm:$0xff]  ;;  %v1792_v8 = vunpack.i.l.bf16 %v1791_v32  ;;  %vm4153_vm2 = vcmask 130048   ;;  %v4154_v31 = vunpack.i.h.bf16 %v3062_v21 }
 0x21a   :  { %v784_v3 = vsel %vm4140_vm4, %v1753_v11, %v1788_v42  ;;  %v783_v0 = vsel %vm4141_vm11, %v1752_v37, %v1787_v34  ;;  %1380 = vmatpush.bf16.msk.msra.mxu1 %vm4146_vm14, %v1379_v39  ;;  %vm4148_vm7 = vmpackc.low %vm4147_vm9, %vm4147_vm9  ;;  %vm4150_vm4 = vnez %v4149_v54  ;;  %v1382_v48 = vpack.c.bf16 %v818_v40, %v817_v52 }
 0x21b   :  { %v1413_v53 = vpack.c.bf16 %v784_v3, %v783_v0  ;;  %vm4151_vm11 = vmpackc.low %vm4150_vm4, %vm4150_vm4  ;;  %vm4155_vm12 = vcmp.lt.s32.totalorder %v1915_v18, 112  ;;  %v4156_v46 = vunpack.i.l.bf16 %v3062_v21  ;;  %v1803_v51 = vunpack.i.h.bf16 %v1801_v22 }
 0x21c   :  { %vm4152_vm10 = vmpackc.low %vm2747_vm8, %vm2747_vm8  ;;  %v986_v59 = vsel %vm4155_vm12, %v1738_v47, %v4154_v31  ;;  %v1802_v3 = vunpack.i.l.bf16 %v1801_v22  ;;  %vm4158_vm0 = vnez %v3858_v27  ;;  %vm4160_vm9 = vcmp.lt.s32.totalorder %v1915_v18, 17 }
 0x21d   :  { %1414 = vmatpush.bf16.msk.msra.mxu0 %vm4148_vm7, %v1413_v53  ;;  %1433 = vmatpush.bf16.msk.msra.mxu2 %vm4152_vm10, %v1432_v2  ;;  %vm4157_vm8 = vmmov %vm4155_vm12  ;;  %v785_v0 = vsel %vm4160_vm9, %v1792_v8, %v1752_v37  ;;  %vm4162_vm4 = vcmp.lt.s32.totalorder %v1915_v18, 15  ;;  %vm4164_vm10 = vcmp.lt.s32.totalorder %v1915_v18, 16  ;;  %vm4166_vm12 = vnez %v3909_v30 }
 0x21e   :  { %1474 = vmatmul.msk.bf16.vlgmr.msra.gmra.mxu3 %vm4153_vm2, %v3196_v17  ;;  %v985_v58 = vsel %vm4157_vm8, %v1737_v56, %v4156_v46  ;;  %vm4159_vm14 = vmpackc.low %vm4158_vm0, %vm4158_vm0  ;;  %v814_v37 = vsel %vm4164_vm10, %v1743_v62, %v1803_v51  ;;  %vm4169_vm0 = vcmp.lt.s32.totalorder %v1915_v18, 113  ;;  %v4178_v53 = vunpack.i.l.bf16 %v3070_v12 }
 0x21f   :  { %v1796_v1 = vpop.permute.xlu1 %1795  ;;  %1383 = vmatpush.bf16.msk.msra.mxu1 %vm4159_vm14, %v1382_v48  ;;  %vm4161_vm7 = vmmov %vm4160_vm9  ;;  %v1448_v27 = vpack.c.bf16 %v986_v59, %v985_v58  ;;  %v1806_v30 = vpop.permute.xlu0 %1805 }
 0x220   :  { %v1798_v6 = vunpack.i.h.bf16 %v1796_v1  ;;  %v1797_v24 = vunpack.i.l.bf16 %v1796_v1  ;;  %1111 = vmatmul.bf16.vlgmr.msra.gmra.mxu0 %v3458_v16  ;;  %v786_v47 = vsel %vm4161_vm7, %v1793_v55, %v1753_v11  ;;  %vm4165_vm2 = vmmov %vm4164_vm10  ;;  %vm4173_vm7 = vnez %v3884_v4  ;;  %v729_v48 = vpop.f32.mrf.mxu0 }
 0x221   :  { %1417 = vmatpush.bf16.msk.msrb.mxu0 %vm4151_vm11, %v1416_v57  ;;  %v1385_v10 = vpack.c.bf16 %v786_v47, %v785_v0  ;;  %vm4163_vm11 = vmmov %vm4162_vm4  ;;  %v813_v11 = vsel %vm4165_vm2, %v1742_v33, %v1802_v3  ;;  %v1807_v62 = vunpack.i.l.bf16 %v1806_v30  ;;  %v4176_v33 = vunpack.i.h.bf16 %v3334_v60 }
 0x222   :  { %v846_v21 = vsel %vm4162_vm4, %v1713_v26, %v1798_v6  ;;  %v845_v56 = vsel %vm4163_vm11, %v1712_v7, %v1797_v24  ;;  %vm4167_vm8 = vmpackc.low %vm4166_vm12, %vm4166_vm12  ;;  %v954_v26 = vsel %vm4169_vm0, %v1758_v36, %v4168_v49  ;;  %v4170_v7 = vunpack.i.l.bf16 %v3064_v25  ;;  %v4214_v49 = vld [vmem:[#allocation13_spill] sm:$0xff] }
 0x223   :  { %v1435_v39 = vpack.c.bf16 %v846_v21, %v845_v56  ;;  %1386 = vmatpush.bf16.msk.msra.mxu1 %vm4167_vm8, %v1385_v10  ;;  %vm4171_vm14 = vmmov %vm4169_vm0  ;;  %v1438_v36 = vpack.c.bf16 %v814_v37, %v813_v11  ;;  %v1808_v25 = vunpack.i.h.bf16 %v1806_v30  ;;  %v4179_v4 = vunpack.i.l.bf16 %v3334_v60 }
 0x224   :  { %v953_v50 = vsel %vm4171_vm14, %v1757_v44, %v4170_v7  ;;  %vm4172_vm9 = vmpackc.low %vm2840_vm1, %vm2840_vm1  ;;  %v4175_v44 = vunpack.i.h.bf16 %v3070_v12  ;;  %vm4177_vm1 = vcmp.lt.s32.totalorder %v1915_v18, 127  ;;  %vm4181_vm10 = vcmp.lt.s32.totalorder %v1915_v18, 17  ;;  %v4215_v7 = vld [vmem:[#allocation10_spill] sm:$0xff] }
 0x225   :  { %1436 = vmatpush.bf16.msk.msra.mxu2 %vm4172_vm9, %v1435_v39  ;;  %vm4174_vm4 = vmpackc.low %vm4173_vm7, %vm4173_vm7  ;;  %v1451_v23 = vpack.c.bf16 %v954_v26, %v953_v50  ;;  %v781_v40 = vsel %vm4181_vm10, %v1787_v34, %v1807_v62  ;;  %vm4184_vm8 = vnez %v3947_v61  ;;  %vm4187_vm9 = vnez %v3962_v5 }
 0x226   :  { %1083 = vmatmul.bf16.vlgmr.msra.gmra.mxu1 %v3458_v16  ;;  %v922_v19 = vsel %vm4177_vm1, %v4176_v33, %v4175_v44  ;;  %vm4180_vm11 = vmmov %vm4177_vm1  ;;  %vm4189_vm7 = vcmask 130048   ;;  %v4190_v61 = vunpack.i.l.bf16 %v3109_v20 }
 0x227   :  { %1449 = vmatpush.bf16.msk.msrb.mxu1 %vm4174_vm4, %v1448_v27  ;;  %v921_v57 = vsel %vm4180_vm11, %v4179_v4, %v4178_v53  ;;  %vm4182_vm2 = vmmov %vm4181_vm10  ;;  %vm4191_vm4 = vcmp.lt.s32.totalorder %v1915_v18, 1  ;;  %vm4198_vm10 = vcmp.lt.s32.totalorder %v1915_v18, 15 }
 0x228   :  { %v782_v52 = vsel %vm4182_vm2, %v1788_v42, %v1808_v25  ;;  %vm4183_vm12 = vmpackc.low %vm2760_vm3, %vm2760_vm3  ;;  %v1454_v60 = vpack.c.bf16 %v922_v19, %v921_v57  ;;  %v875_v45 = vsel %vm4191_vm4, %v1747_v35, %v4190_v61  ;;  %v4195_v42 = vld [vmem:[#allocation5_spill] sm:$0xff]  ;;  %v844_v35 = vsel %vm4198_vm10, %v1798_v6, %v1773_v63  ;;  %v731_v1 = vpop.f32.mrf.mxu0 }
 0x229   :  { %1439 = vmatpush.bf16.msk.msra.mxu2 %vm4183_vm12, %v1438_v36  ;;  %v1441_v12 = vpack.c.bf16 %v782_v52, %v781_v40  ;;  %vm4185_vm0 = vmpackc.low %vm4184_vm8, %vm4184_vm8  ;;  %vm4196_vm1 = vnez %v4195_v42  ;;  %vm4201_vm12 = vnez %v4200_v15  ;;  %v4216_v40 = vld [vmem:[#allocation12_spill] sm:$0xff] }
 0x22a   :  { %vm4186_vm14 = vmpackc.low %vm2931_vm15, %vm2931_vm15 }
 0x22b   :  { %1452 = vmatpush.bf16.msk.msrb.mxu1 %vm4185_vm0, %v1451_v23  ;;  %vm4188_vm3 = vmpackc.low %vm4187_vm9, %vm4187_vm9  ;;  %vm4203_vm0 = vcmp.lt.s32.totalorder %v1915_v18, 16 }
 0x22c   :  { %vm4193_vm15 = vmmov %vm4191_vm4  ;;  %v811_v34 = vsel %vm4203_vm0, %v1802_v3, %v1782_v9  ;;  %v710_v9 = vpop.f32.mrf.mxu3  ;;  %v4213_v3 = vld [vmem:[#allocation11_spill] sm:$0xff] }
 0x22d   :  { %1442 = vmatpush.bf16.msk.msra.mxu2 %vm4186_vm14, %v1441_v12  ;;  %v876_v5 = vsel %vm4193_vm15, %v1748_v41, %v4192_v38  ;;  %vm4197_vm11 = vmpackc.low %vm4196_vm1, %vm4196_vm1 }
 0x22e   :  { %vm4199_vm2 = vmmov %vm4198_vm10 }
 0x22f   :  { %1455 = vmatpush.bf16.msk.msrb.mxu1 %vm4188_vm3, %v1454_v60  ;;  %v843_v20 = vsel %vm4199_vm2, %v1797_v24, %v1772_v14  ;;  %vm4202_vm8 = vmpackc.low %vm4201_vm12, %vm4201_vm12  ;;  %vm4207_vm3 = vcmp.lt.s32.totalorder %v1915_v18, 17  ;;  %v691_v18 = vpop.f32.mrf.mxu1  ;;  %v748_v24 = vpop.f32.mrf.mxu2 }
 0x230   :  { %1418 = vmatmul.msk.bf16.vlgmr.msrb.gmra.mxu0 %vm4189_vm7, %v3196_v17  ;;  %1139 = vmatmul.bf16.vlgmr.msra.gmra.mxu2 %v3458_v16  ;;  %v1460_v17 = vpack.c.bf16 %v876_v5, %v875_v45  ;;  %v1463_v41 = vpack.c.bf16 %v844_v35, %v843_v20  ;;  %vm4204_vm14 = vmmov %vm4203_vm0  ;;  %v779_v2 = vsel %vm4207_vm3, %v1807_v62, %v1792_v8 }
 0x231   :  { %v812_v28 = vsel %vm4204_vm14, %v1803_v51, %v1783_v43  ;;  %vm4206_vm9 = vmpackc.low %vm2889_vm5, %vm2889_vm5  ;;  %v711_v33 = vadd.f32 %v710_v9, %v691_v18  ;;  %v749_v15 = vadd.f32 %v748_v24, %v729_v48 }
 0x232   :  { %v1466_v14 = vpack.c.bf16 %v812_v28, %v811_v34  ;;  %vm4208_vm7 = vmmov %vm4207_vm3 }
 0x233   :  { %1458 = vmatpush.bf16.msk.msrb.mxu1 %vm4197_vm11, %v4194_v13  ;;  %v780_v22 = vsel %vm4208_vm7, %v1808_v25, %v1793_v55  ;;  %vm4210_vm4 = vmpackc.low %vm2825_vm13, %vm2825_vm13 }
 0x234   :  { %v1469_v29 = vpack.c.bf16 %v780_v22, %v779_v2  ;;  %vm4212_vm5 = vmpackc.low %vm2976_vm6, %vm2976_vm6  ;;  %v712_v32 = vpop.f32.mrf.mxu3 }
 0x237   :  { %1461 = vmatpush.bf16.msk.msrb.mxu1 %vm4202_vm8, %v1460_v17  ;;  %v693_v8 = vpop.f32.mrf.mxu1  ;;  %v750_v47 = vpop.f32.mrf.mxu2 }
 0x238   :  { %v713_v38 = vadd.f32 %v712_v32, %v693_v8  ;;  %v751_v22 = vadd.f32 %v750_v47, %v731_v1 }
 0x23b   :  { %1464 = vmatpush.bf16.msk.msrb.mxu1 %vm4206_vm9, %v1463_v41 }
 0x23f   :  { %1467 = vmatpush.bf16.msk.msrb.mxu1 %vm4210_vm4, %v1466_v14 }
 0x243   :  { %1470 = vmatpush.bf16.msk.msrb.mxu1 %vm4212_vm5, %v1469_v29 }
 0x246   :  { %1167 = vmatmul.bf16.vlgmr.msrb.gmra.mxu1 %v3458_v16 }
 0x281   :  { %v1098_v55 = vpop.f32.mrf.mxu3 }
 0x289   :  { %v1100_v31 = vpop.f32.mrf.mxu3 }
 0x291   :  { %v1154_v10 = vpop.f32.mrf.mxu3 }
 0x299   :  { %v1156_v19 = vpop.f32.mrf.mxu3 }
 0x29d   :  { %v1112_v6 = vpop.f32.mrf.mxu0 }
 0x2a1   :  { %v1182_v13 = vpop.f32.mrf.mxu3 }
 0x2a3   :  { %v1084_v59 = vpop.f32.mrf.mxu1 }
 0x2a4   :  { %v1099_v58 = vadd.f32 %v1098_v55, %v1084_v59 }
 0x2a5   :  { %v1114_v46 = vpop.f32.mrf.mxu0 }
 0x2a6   :  { %v1187_v51 = vmax.f32 %v1099_v58, 0.0 }
 0x2a8   :  { %v1195_v0 = vadd.f32 %v1187_v51, %v4213_v3 }
 0x2a9   :  { %v1184_v63 = vpop.f32.mrf.mxu3 }
 0x2aa   :  { %v1203_v21 = vmax.f32 %v1195_v0, 0.0 }
 0x2ab   :  { %v1086_v16 = vpop.f32.mrf.mxu1 }
 0x2ac   :  { %1211 = vst [vmem:[%s3681_s3] sm:$0xff] %v1203_v21  ;;  %v1101_v27 = vadd.f32 %v1100_v31, %v1086_v16 }
 0x2ad   :  { %v1126_v56 = vpop.f32.mrf.mxu0 }
 0x2ae   :  { %v1127_v39 = vadd.f32 %v1126_v56, %v1112_v6  ;;  %v1191_v37 = vmax.f32 %v1101_v27, 0.0 }
 0x2b0   :  { %v1188_v11 = vmax.f32 %v1127_v39, 0.0  ;;  %v1199_v26 = vadd.f32 %v1191_v37, %v4214_v49 }
 0x2b2   :  { %v1196_v50 = vadd.f32 %v1188_v11, %v4215_v7  ;;  %v1207_v30 = vmax.f32 %v1199_v26, 0.0 }
 0x2b3   :  { %v1140_v25 = vpop.f32.mrf.mxu2 }
 0x2b4   :  { %v1204_v36 = vmax.f32 %v1196_v50, 0.0  ;;  %v1155_v62 = vadd.f32 %v1154_v10, %v1140_v25  ;;  %1215 = vst [vmem:[%s3681_s3 + $0x20] sm:$0xff] %v1207_v30 }
 0x2b5   :  { %v1128_v23 = vpop.f32.mrf.mxu0 }
 0x2b6   :  { %v1129_v44 = vadd.f32 %v1128_v23, %v1114_v46  ;;  %1212 = vst [vmem:[%s3681_s3 + $0x8] sm:$0xff] %v1204_v36  ;;  %v1189_v53 = vmax.f32 %v1155_v62, 0.0 }
 0x2b8   :  { %v1192_v4 = vmax.f32 %v1129_v44, 0.0  ;;  %v1197_v57 = vadd.f32 %v1189_v53, %v711_v33 }
 0x2ba   :  { %v1200_v52 = vadd.f32 %v1192_v4, %v4216_v40  ;;  %v1205_v12 = vmax.f32 %v1197_v57, 0.0 }
 0x2bb   :  { %v1142_v61 = vpop.f32.mrf.mxu2 }
 0x2bc   :  { %v1208_v60 = vmax.f32 %v1200_v52, 0.0  ;;  %1213 = vst [vmem:[%s3681_s3 + $0x10] sm:$0xff] %v1205_v12  ;;  %v1157_v45 = vadd.f32 %v1156_v19, %v1142_v61 }
 0x2be   :  { %1216 = vst [vmem:[%s3681_s3 + $0x28] sm:$0xff] %v1208_v60  ;;  %v1193_v5 = vmax.f32 %v1157_v45, 0.0 }
 0x2c0   :  { %v1201_v42 = vadd.f32 %v1193_v5, %v713_v38 }
 0x2c2   :  { %v1209_v17 = vmax.f32 %v1201_v42, 0.0 }
 0x2c3   :  { %v1168_v35 = vpop.f32.mrf.mxu1 }
 0x2c4   :  { %v1183_v20 = vadd.f32 %v1182_v13, %v1168_v35  ;;  %1217 = vst [vmem:[%s3681_s3 + $0x30] sm:$0xff] %v1209_v17 }
 0x2c6   :  { %v1190_v41 = vmax.f32 %v1183_v20, 0.0 }
 0x2c8   :  { %v1198_v34 = vadd.f32 %v1190_v41, %v749_v15 }
 0x2ca   :  { %v1206_v28 = vmax.f32 %v1198_v34, 0.0 }
 0x2cb   :  { %v1170_v14 = vpop.f32.mrf.mxu1 }
 0x2cc   :  { %1214 = vst [vmem:[%s3681_s3 + $0x18] sm:$0xff] %v1206_v28  ;;  %v1185_v2 = vadd.f32 %v1184_v63, %v1170_v14 }
 0x2ce   :  { %v1194_v54 = vmax.f32 %v1185_v2, 0.0 }
 0x2d0   :  { %v1202_v29 = vadd.f32 %v1194_v54, %v751_v22 }
 0x2d2   :  { %v1210_v43 = vmax.f32 %v1202_v29, 0.0 }
 0x2d4   :  { %1218 = vst [vmem:[%s3681_s3 + $0x38] sm:$0xff] %v1210_v43 }

</bundles_post_ra>
